<compile_context>
chip_gen: v6e
topology: v6e:2x2x1
jax: 0.10.0
libtpu: 0.0.40
codegen_flags: <defaults>
</compile_context>

<pallas_src>
import functools

import jax
import jax.numpy as jnp
from jax import lax
from jax.experimental import pallas as pl
from jax.experimental.pallas import tpu as pltpu

NEG_BIG = -1e30                       # f32-safe large-negative mask sentinel
HP = jax.lax.Precision.HIGHEST        # full-f32 matmuls: kernel must match the reference


def _sigmoid(x):
    # Exact 1/(1+exp(-x)); handles exp overflow to inf cleanly (1/inf -> 0).
    return 1.0 / (1.0 + jnp.exp(-x))


def tarmac_kernel(x_ref, h_ref, adj_ref,
                  wx_all_ref, bx_all_ref,
                  wh_all_ref, bh_rzn_ref,
                  wc_rzn_ref,
                  h_out_ref,
                  *, n_rounds, hidden, msg, key, vsq_pad):
    f32 = jnp.float32
    H, M, K = hidden, msg, key
    P = vsq_pad                                     # 128-aligned end of the [v|s|q|pad] segment

    def mm(a, b):
        return jnp.dot(a, b, preferred_element_type=f32, precision=HP)

    x = x_ref[...]                                  # (N, H)
    h = h_ref[...]                                  # (N, H)

    # Additive mask bias, built once (outside the round loop) from the int8 adjacency.
    adj_f = adj_ref[...].astype(f32)                # (N_dst, N_src)
    mask_bias = jnp.where(adj_f > 0.0, f32(0.0), f32(NEG_BIG))

    # Hoist all weight/bias loads out of the unrolled round loop.
    wh_all = wh_all_ref[...]                        # (H, P + 3H) = [v|s|q/K|pad | r|z|n]
    wc_rzn = wc_rzn_ref[...]                        # (M, 3H)     = [Wir_c|Wiz_c|Win_c]
    bh_rzn = bh_rzn_ref[...]                        # (1, 3H)

    # Loop-invariant x projections: one fused matmul, reused every round.
    xb_all = mm(x, wx_all_ref[...]) + bx_all_ref[...]   # (N, P + 3H)
    xb_vsq = xb_all[:, :P]                              # [v | s | q/K | pad]  (lane-aligned split)
    xb_rzn = xb_all[:, P:]                              # [r | z | n] x-part (+ input bias)

    # n_rounds is a compile-time constant -> static unroll (fine for small n_rounds).
    for _ in range(n_rounds):
        # One fused h-projection per round: [v | s | q/K | pad | r_h | z_h | n_h].
        h_all = mm(h, wh_all)                            # (N, P + 3H)
        vsq = xb_vsq + h_all[:, :P]
        v = vsq[:, :M]                                   # (N, M)
        s = vsq[:, M:M + K]                              # (N, K)
        q = vsq[:, M + K:M + 2 * K]                      # (N, K), pre-scaled by 1/key_size
        gates_h = h_all[:, P:] + bh_rzn                  # (N, 3H)

        # Edge scores, transposed: eT[j, i] = <q_j, s_i> / key_size for edge i -> j.
        eT = lax.dot_general(q, s, (((1,), (1,)), ((), ())),
                             preferred_element_type=f32, precision=HP)   # (N_dst, N_src)

        # edge_softmax over incoming edges of each destination (lane-axis reduce).
        masked = eT + mask_bias                          # non-edges -> ~ -1e30
        m = jnp.max(masked, axis=-1, keepdims=True)
        m = jnp.where(m < f32(-1e29), f32(0.0), m)       # dst with no in-edge
        p = jnp.exp(masked - m)                          # underflows to exactly 0 on non-edges
        denom = jnp.sum(p, axis=-1, keepdims=True)
        inv = pl.reciprocal(jnp.where(denom == 0.0, f32(1.0), denom), approx=True)
        aT = p * inv                                     # (N_dst, N_src)

        # Aggregated message c[j] = sum_i a[i, j] * v[i]   (fn.u_mul_e + fn.sum)
        c = mm(aT, v)                                    # (N, M)

        # GRUCell on input cat(x, c), hidden h  (PyTorch gate order r, z, n).
        gates_i = xb_rzn + mm(c, wc_rzn)                 # (N, 3H)
        r = _sigmoid(gates_i[:, :H] + gates_h[:, :H])
        z = _sigmoid(gates_i[:, H:2 * H] + gates_h[:, H:2 * H])
        n = jnp.tanh(gates_i[:, 2 * H:] + r * gates_h[:, 2 * H:])
        h = (1.0 - z) * n + z * h

    h_out_ref[...] = h


def _fuse_params(params, key_size, vsq_pad):
    """Fold 1/key_size into the query projection; fuse weights lane-wise with the
    [v|s|q] segment zero-padded to a 128-lane boundary."""
    (wv_x, wv_h, bv, ws_x, ws_h, bs, wq_x, wq_h, bq,
     wir_x, wir_c, bir, wiz_x, wiz_c, biz, win_x, win_c, bin_,
     whr, bhr, whz, bhz, whn, bhn) = params
    inv_k = jnp.float32(1.0 / key_size)
    wq_x, wq_h, bq = wq_x * inv_k, wq_h * inv_k, bq * inv_k

    vsq = wv_x.shape[1] + 2 * ws_x.shape[1]
    pad = vsq_pad - vsq

    wx_vsq = jnp.pad(jnp.concatenate([wv_x, ws_x, wq_x], axis=1), ((0, 0), (0, pad)))
    wh_vsq = jnp.pad(jnp.concatenate([wv_h, ws_h, wq_h], axis=1), ((0, 0), (0, pad)))
    bx_vsq = jnp.pad(jnp.concatenate([bv, bs, bq], axis=1), ((0, 0), (0, pad)))

    wx_all = jnp.concatenate([wx_vsq, wir_x, wiz_x, win_x], axis=1)   # (H, P + 3H)
    bx_all = jnp.concatenate([bx_vsq, bir, biz, bin_], axis=1)        # (1, P + 3H)
    wh_all = jnp.concatenate([wh_vsq, whr, whz, whn], axis=1)         # (H, P + 3H)
    bh_rzn = jnp.concatenate([bhr, bhz, bhn], axis=1)                 # (1, 3H)
    wc_rzn = jnp.concatenate([wir_c, wiz_c, win_c], axis=1)           # (M, 3H)
    return wx_all, bx_all, wh_all, bh_rzn, wc_rzn


@functools.partial(jax.jit, static_argnames=("n_rounds", "key_size"))
def tarmac_forward(x, h, adj_ds, params, *, n_rounds, key_size):
    """x, h: (B, N, H) f32;  adj_ds: (B, N_dst, N_src) int8."""
    B, N, H = h.shape
    M = params[0].shape[1]                                  # wv_x: (H, M)
    K = params[3].shape[1]                                  # ws_x: (H, K)
    VSQ = M + 2 * K
    P = ((VSQ + 127) // 128) * 128                          # lane-aligned [v|s|q] segment width

    wx_all, bx_all, wh_all, bh_rzn, wc_rzn = _fuse_params(params, key_size, P)

    node_spec = pl.BlockSpec((None, N, H), lambda b: (b, 0, 0))     # per-graph block, batch squeezed
    adj_spec = pl.BlockSpec((None, N, N), lambda b: (b, 0, 0))

    def wspec(a):   # grid-invariant (shared) weight block
        return pl.BlockSpec(a.shape, lambda b, nd=a.ndim: (0,) * nd)

    kernel = functools.partial(tarmac_kernel, n_rounds=n_rounds,
                               hidden=H, msg=M, key=K, vsq_pad=P)
    h_new = pl.pallas_call(
        kernel,
        out_shape=jax.ShapeDtypeStruct((B, N, H), jnp.float32),
        grid=(B,),
        in_specs=[node_spec, node_spec, adj_spec,
                  wspec(wx_all), wspec(bx_all), wspec(wh_all),
                  wspec(bh_rzn), wspec(wc_rzn)],
        out_specs=pl.BlockSpec((None, N, H), lambda b: (b, 0, 0)),
        input_output_aliases={1: 0},                        # h buffer reused for h_out
        compiler_params=pltpu.CompilerParams(dimension_semantics=("parallel",)),
    )(x, h, adj_ds, wx_all, bx_all, wh_all, bh_rzn, wc_rzn)
    return h_new, h_new                                     # module returns (h, h)


def tarmac_ref(x, h, adj_ds, params, *, n_rounds, key_size):
    """Pure-JAX reference mirroring the PyTorch forward semantics (unfused, HIGHEST prec)."""
    d = lambda a, b: jnp.dot(a, b, precision=HP)
    (wv_x, wv_h, bv, ws_x, ws_h, bs, wq_x, wq_h, bq,
     wir_x, wir_c, bir, wiz_x, wiz_c, biz, win_x, win_c, bin_,
     whr, bhr, whz, bhz, whn, bhn) = params

    def one_graph(xg, hg, adj):          # adj: (src, dst) f32
        hcur = hg
        for _ in range(n_rounds):
            v = d(xg, wv_x) + d(hcur, wv_h) + bv
            s = d(xg, ws_x) + d(hcur, ws_h) + bs
            q = d(xg, wq_x) + d(hcur, wq_h) + bq
            e = d(s, q.T) / key_size
            masked = jnp.where(adj > 0, e, NEG_BIG)
            m = jnp.max(masked, axis=0, keepdims=True)
            m = jnp.where(m < -1e29, 0.0, m)
            p = jnp.where(adj > 0, jnp.exp(masked - m), 0.0)
            den = jnp.sum(p, axis=0, keepdims=True)
            a = p / jnp.where(den == 0, 1.0, den)
            c = d(a.T, v)
            r = jax.nn.sigmoid(d(xg, wir_x) + d(c, wir_c) + bir + d(hcur, whr) + bhr)
            z = jax.nn.sigmoid(d(xg, wiz_x) + d(c, wiz_c) + biz + d(hcur, whz) + bhz)
            n = jnp.tanh(d(xg, win_x) + d(c, win_c) + bin_ + r * (d(hcur, whn) + bhn))
            hcur = (1.0 - z) * n + z * hcur
        return hcur

    adj_sd = jnp.transpose(adj_ds, (0, 2, 1)).astype(jnp.float32)   # back to (src, dst)
    return jnp.stack([one_graph(x[b], h[b], adj_sd[b]) for b in range(x.shape[0])])


if __name__ == "__main__":
    B, N, H, M, K, R = 2, 8, 32, 16, 16, 2   # graphs, nodes, hidden, msg_size, key_size, n_rounds

    root = jax.random.PRNGKey(0)
    k_x, k_h, k_par = jax.random.split(root, 3)

    x = jax.random.normal(k_x, (B, N, H), jnp.float32)
    h = jax.random.normal(k_h, (B, N, H), jnp.float32)

    # Deterministic directed graphs, built directly in (dst, src) int8 layout.
    idx = jnp.arange(N)
    a0 = jnp.zeros((N, N), jnp.int8)
    a0 = a0.at[idx, idx].set(1)               # self loops
    a0 = a0.at[(idx + 1) % N, idx].set(1)     # edge i -> i+1
    a0 = a0.at[(idx + 2) % N, idx].set(1)     # edge i -> i+2
    a1 = jnp.zeros((N, N), jnp.int8)
    a1 = a1.at[idx, idx].set(1)
    a1 = a1.at[(idx + 3) % N, idx].set(1)     # edge i -> i+3
    a1 = a1.at[3, :].set(0)                   # node 3 of graph 1 has no in-edges (exercise guard)
    adj_ds = jnp.stack([a0, a1])              # (B, N_dst, N_src) int8

    # Deterministic parameters in PyTorch shapes, then mapped to kernel layout.
    def uni(k, shape, fan_in):
        bound = 1.0 / (fan_in ** 0.5)
        return jax.random.uniform(k, shape, jnp.float32, -bound, bound)

    pk = jax.random.split(k_par, 10)
    Wv, bv = uni(pk[0], (M, 2 * H), 2 * H), uni(pk[1], (M,), 2 * H)
    Ws, bs = uni(pk[2], (K, 2 * H), 2 * H), uni(pk[3], (K,), 2 * H)
    Wq, bq = uni(pk[4], (K, 2 * H), 2 * H), uni(pk[5], (K,), 2 * H)
    Wih = uni(pk[6], (3 * H, H + M), H)       # GRUCell init scale 1/sqrt(hidden)
    Whh = uni(pk[7], (3 * H, H), H)
    bih = uni(pk[8], (3 * H,), H)
    bhh = uni(pk[9], (3 * H,), H)

    def lin_split(W, b):
        return W[:, :H].T, W[:, H:].T, b[None, :]

    wv_x, wv_h, bv2 = lin_split(Wv, bv)
    ws_x, ws_h, bs2 = lin_split(Ws, bs)
    wq_x, wq_h, bq2 = lin_split(Wq, bq)

    Wir, Wiz, Win = Wih[:H], Wih[H:2 * H], Wih[2 * H:]
    Whr, Whz, Whn = Whh[:H], Whh[H:2 * H], Whh[2 * H:]
    params = (
        wv_x, wv_h, bv2,
        ws_x, ws_h, bs2,
        wq_x, wq_h, bq2,
        Wir[:, :H].T, Wir[:, H:].T, bih[:H][None, :],
        Wiz[:, :H].T, Wiz[:, H:].T, bih[H:2 * H][None, :],
        Win[:, :H].T, Win[:, H:].T, bih[2 * H:][None, :],
        Whr.T, bhh[:H][None, :],
        Whz.T, bhh[H:2 * H][None, :],
        Whn.T, bhh[2 * H:][None, :],
    )

    h_new, h_new2 = tarmac_forward(x, h, adj_ds, params, n_rounds=R, key_size=K)
    jax.block_until_ready(h_new)

    h_ref = tarmac_ref(x, h, adj_ds, params, n_rounds=R, key_size=K)
    assert h_new.shape == h_ref.shape
    # Kernel matmuls run at HIGHEST precision like the reference; remaining delta is
    # the approx EUP reciprocal in the softmax normalization and fusion reorderings.
    assert jnp.allclose(h_new, h_ref, rtol=2e-3, atol=2e-3), "mismatch vs reference"

    print("KERNEL_OK")
</pallas_src>

<mosaic_0001>
module attributes {stable_mosaic.version = 11 : i64} {
  func.func @tarmac_kernel(%arg0: i32, %arg1: memref<1x8x32xf32, #tpu.memory_space<vmem>>, %arg2: memref<1x8x32xf32, #tpu.memory_space<vmem>>, %arg3: memref<1x8x8xi8, #tpu.memory_space<vmem>>, %arg4: memref<32x224xf32, #tpu.memory_space<vmem>>, %arg5: memref<1x224xf32, #tpu.memory_space<vmem>>, %arg6: memref<32x224xf32, #tpu.memory_space<vmem>>, %arg7: memref<1x96xf32, #tpu.memory_space<vmem>>, %arg8: memref<16x96xf32, #tpu.memory_space<vmem>>, %arg9: memref<1x8x32xf32, #tpu.memory_space<vmem>>) attributes {dimension_semantics = [#tpu.dimension_semantics<parallel>], iteration_bounds = array<i64: 2>, scalar_prefetch = 0 : i64, scratch_operands = 0 : i64, tpu.core_type = #tpu.core_type<tc>, window_params = [{transform_indices = @transform_0, window_bounds = array<i64: 1, 8, 32>}, {transform_indices = @transform_1, window_bounds = array<i64: 1, 8, 32>}, {transform_indices = @transform_2, window_bounds = array<i64: 1, 8, 8>}, {pipeline_mode = #tpu.pipeline_mode<synchronous>, transform_indices = @transform_3, window_bounds = array<i64: 32, 224>}, {pipeline_mode = #tpu.pipeline_mode<synchronous>, transform_indices = @transform_4, window_bounds = array<i64: 1, 224>}, {pipeline_mode = #tpu.pipeline_mode<synchronous>, transform_indices = @transform_5, window_bounds = array<i64: 32, 224>}, {pipeline_mode = #tpu.pipeline_mode<synchronous>, transform_indices = @transform_6, window_bounds = array<i64: 1, 96>}, {pipeline_mode = #tpu.pipeline_mode<synchronous>, transform_indices = @transform_7, window_bounds = array<i64: 16, 96>}, {transform_indices = @transform_8, window_bounds = array<i64: 1, 8, 32>}]} {
    %c0 = arith.constant 0 : index
    %c0_0 = arith.constant 0 : index
    %c0_1 = arith.constant 0 : index
    %0 = vector.load %arg1[%c0, %c0_0, %c0_1] : memref<1x8x32xf32, #tpu.memory_space<vmem>>, vector<1x8x32xf32>
    %1 = vector.shape_cast %0 : vector<1x8x32xf32> to vector<8x32xf32>
    %c0_2 = arith.constant 0 : index
    %c0_3 = arith.constant 0 : index
    %c0_4 = arith.constant 0 : index
    %2 = vector.load %arg2[%c0_2, %c0_3, %c0_4] : memref<1x8x32xf32, #tpu.memory_space<vmem>>, vector<1x8x32xf32>
    %3 = vector.shape_cast %2 : vector<1x8x32xf32> to vector<8x32xf32>
    %c0_5 = arith.constant 0 : index
    %c0_6 = arith.constant 0 : index
    %c0_7 = arith.constant 0 : index
    %4 = vector.load %arg3[%c0_5, %c0_6, %c0_7] : memref<1x8x8xi8, #tpu.memory_space<vmem>>, vector<1x8x8xi8>
    %5 = vector.shape_cast %4 : vector<1x8x8xi8> to vector<8x8xi8>
    %6 = arith.sitofp %5 : vector<8x8xi8> to vector<8x8xf32>
    %cst = arith.constant 0.000000e+00 : f32
    %7 = vector.broadcast %cst : f32 to vector<8x8xf32>
    %8 = arith.cmpf ogt, %6, %7 : vector<8x8xf32>
    %cst_8 = arith.constant 0.000000e+00 : f32
    %cst_9 = arith.constant -1.000000e+30 : f32
    %9 = vector.broadcast %cst_8 : f32 to vector<8x8xf32>
    %10 = vector.broadcast %cst_9 : f32 to vector<8x8xf32>
    %11 = arith.select %8, %9, %10 : vector<8x8xi1>, vector<8x8xf32>
    %c0_10 = arith.constant 0 : index
    %c0_11 = arith.constant 0 : index
    %12 = vector.load %arg6[%c0_10, %c0_11] : memref<32x224xf32, #tpu.memory_space<vmem>>, vector<32x224xf32>
    %c0_12 = arith.constant 0 : index
    %c0_13 = arith.constant 0 : index
    %13 = vector.load %arg8[%c0_12, %c0_13] : memref<16x96xf32, #tpu.memory_space<vmem>>, vector<16x96xf32>
    %c0_14 = arith.constant 0 : index
    %c0_15 = arith.constant 0 : index
    %14 = vector.load %arg7[%c0_14, %c0_15] : memref<1x96xf32, #tpu.memory_space<vmem>>, vector<1x96xf32>
    %c0_16 = arith.constant 0 : index
    %c0_17 = arith.constant 0 : index
    %15 = vector.load %arg4[%c0_16, %c0_17] : memref<32x224xf32, #tpu.memory_space<vmem>>, vector<32x224xf32>
    %cst_18 = arith.constant dense<0.000000e+00> : vector<8x224xf32>
    %16 = tpu.matmul %1, %15, %cst_18 {dimension_numbers = #tpu.dot_dimension_numbers<[1], [0], [0], [1], [0, 0, 1, 1], [], []>, precision = #tpu.contract_precision<fp32>} : vector<8x32xf32>, vector<32x224xf32>, vector<8x224xf32> -> vector<8x224xf32>
    %c0_19 = arith.constant 0 : index
    %c0_20 = arith.constant 0 : index
    %17 = vector.load %arg5[%c0_19, %c0_20] : memref<1x224xf32, #tpu.memory_space<vmem>>, vector<1x224xf32>
    %18 = vector.broadcast %17 : vector<1x224xf32> to vector<8x224xf32>
    %19 = arith.addf %16, %18 : vector<8x224xf32>
    %20 = vector.extract_strided_slice %19 {offsets = [0, 0], sizes = [8, 128], strides = [1, 1]} : vector<8x224xf32> to vector<8x128xf32>
    %21 = vector.extract_strided_slice %19 {offsets = [0, 128], sizes = [8, 96], strides = [1, 1]} : vector<8x224xf32> to vector<8x96xf32>
    %cst_21 = arith.constant dense<0.000000e+00> : vector<8x224xf32>
    %22 = tpu.matmul %3, %12, %cst_21 {dimension_numbers = #tpu.dot_dimension_numbers<[1], [0], [0], [1], [0, 0, 1, 1], [], []>, precision = #tpu.contract_precision<fp32>} : vector<8x32xf32>, vector<32x224xf32>, vector<8x224xf32> -> vector<8x224xf32>
    %23 = vector.extract_strided_slice %22 {offsets = [0, 0], sizes = [8, 128], strides = [1, 1]} : vector<8x224xf32> to vector<8x128xf32>
    %24 = arith.addf %20, %23 : vector<8x128xf32>
    %25 = vector.extract_strided_slice %24 {offsets = [0, 0], sizes = [8, 16], strides = [1, 1]} : vector<8x128xf32> to vector<8x16xf32>
    %26 = vector.extract_strided_slice %24 {offsets = [0, 16], sizes = [8, 16], strides = [1, 1]} : vector<8x128xf32> to vector<8x16xf32>
    %27 = vector.extract_strided_slice %24 {offsets = [0, 32], sizes = [8, 16], strides = [1, 1]} : vector<8x128xf32> to vector<8x16xf32>
    %28 = vector.extract_strided_slice %22 {offsets = [0, 128], sizes = [8, 96], strides = [1, 1]} : vector<8x224xf32> to vector<8x96xf32>
    %29 = vector.broadcast %14 : vector<1x96xf32> to vector<8x96xf32>
    %30 = arith.addf %28, %29 : vector<8x96xf32>
    %cst_22 = arith.constant dense<0.000000e+00> : vector<8x8xf32>
    %31 = tpu.matmul %27, %26, %cst_22 {dimension_numbers = #tpu.dot_dimension_numbers<[1], [1], [0], [0], [0, 0, 1, 0], [], []>, precision = #tpu.contract_precision<fp32>} : vector<8x16xf32>, vector<8x16xf32>, vector<8x8xf32> -> vector<8x8xf32>
    %32 = arith.addf %31, %11 : vector<8x8xf32>
    %cst_23 = arith.constant dense<0xFF800000> : vector<8xf32>
    %33 = vector.multi_reduction <maximumf>, %32, %cst_23 [1] : vector<8x8xf32> to vector<8xf32>
    %34 = vector.shape_cast %33 : vector<8xf32> to vector<8x1xf32>
    %cst_24 = arith.constant -1.000000e+29 : f32
    %35 = vector.broadcast %cst_24 : f32 to vector<8x1xf32>
    %36 = arith.cmpf olt, %34, %35 : vector<8x1xf32>
    %cst_25 = arith.constant 0.000000e+00 : f32
    %37 = vector.broadcast %cst_25 : f32 to vector<8x1xf32>
    %38 = arith.select %36, %37, %34 : vector<8x1xi1>, vector<8x1xf32>
    %39 = vector.broadcast %38 : vector<8x1xf32> to vector<8x8xf32>
    %40 = arith.subf %32, %39 : vector<8x8xf32>
    %41 = math.exp %40 : vector<8x8xf32>
    %cst_26 = arith.constant dense<0.000000e+00> : vector<8xf32>
    %42 = vector.multi_reduction <add>, %41, %cst_26 [1] : vector<8x8xf32> to vector<8xf32>
    %43 = vector.shape_cast %42 : vector<8xf32> to vector<8x1xf32>
    %cst_27 = arith.constant 0.000000e+00 : f32
    %44 = vector.broadcast %cst_27 : f32 to vector<8x1xf32>
    %45 = arith.cmpf oeq, %43, %44 : vector<8x1xf32>
    %cst_28 = arith.constant 1.000000e+00 : f32
    %46 = vector.broadcast %cst_28 : f32 to vector<8x1xf32>
    %47 = arith.select %45, %46, %43 : vector<8x1xi1>, vector<8x1xf32>
    %48 = tpu.reciprocal %47 {approx = true} : vector<8x1xf32> -> vector<8x1xf32>
    %49 = vector.broadcast %48 : vector<8x1xf32> to vector<8x8xf32>
    %50 = arith.mulf %41, %49 : vector<8x8xf32>
    %cst_29 = arith.constant dense<0.000000e+00> : vector<8x16xf32>
    %51 = tpu.matmul %50, %25, %cst_29 {dimension_numbers = #tpu.dot_dimension_numbers<[1], [0], [0], [1], [0, 0, 1, 1], [], []>, precision = #tpu.contract_precision<fp32>} : vector<8x8xf32>, vector<8x16xf32>, vector<8x16xf32> -> vector<8x16xf32>
    %cst_30 = arith.constant dense<0.000000e+00> : vector<8x96xf32>
    %52 = tpu.matmul %51, %13, %cst_30 {dimension_numbers = #tpu.dot_dimension_numbers<[1], [0], [0], [1], [0, 0, 1, 1], [], []>, precision = #tpu.contract_precision<fp32>} : vector<8x16xf32>, vector<16x96xf32>, vector<8x96xf32> -> vector<8x96xf32>
    %53 = arith.addf %21, %52 : vector<8x96xf32>
    %54 = vector.extract_strided_slice %53 {offsets = [0, 0], sizes = [8, 32], strides = [1, 1]} : vector<8x96xf32> to vector<8x32xf32>
    %55 = vector.extract_strided_slice %30 {offsets = [0, 0], sizes = [8, 32], strides = [1, 1]} : vector<8x96xf32> to vector<8x32xf32>
    %56 = arith.addf %54, %55 : vector<8x32xf32>
    %cst_31 = arith.constant 0.000000e+00 : f32
    %57 = vector.broadcast %cst_31 : f32 to vector<8x32xf32>
    %58 = arith.subf %57, %56 : vector<8x32xf32>
    %59 = math.exp %58 : vector<8x32xf32>
    %cst_32 = arith.constant 1.000000e+00 : f32
    %60 = vector.broadcast %cst_32 : f32 to vector<8x32xf32>
    %61 = arith.addf %60, %59 : vector<8x32xf32>
    %cst_33 = arith.constant 1.000000e+00 : f32
    %62 = vector.broadcast %cst_33 : f32 to vector<8x32xf32>
    %63 = arith.divf %62, %61 : vector<8x32xf32>
    %64 = vector.extract_strided_slice %53 {offsets = [0, 32], sizes = [8, 32], strides = [1, 1]} : vector<8x96xf32> to vector<8x32xf32>
    %65 = vector.extract_strided_slice %30 {offsets = [0, 32], sizes = [8, 32], strides = [1, 1]} : vector<8x96xf32> to vector<8x32xf32>
    %66 = arith.addf %64, %65 : vector<8x32xf32>
    %cst_34 = arith.constant 0.000000e+00 : f32
    %67 = vector.broadcast %cst_34 : f32 to vector<8x32xf32>
    %68 = arith.subf %67, %66 : vector<8x32xf32>
    %69 = math.exp %68 : vector<8x32xf32>
    %cst_35 = arith.constant 1.000000e+00 : f32
    %70 = vector.broadcast %cst_35 : f32 to vector<8x32xf32>
    %71 = arith.addf %70, %69 : vector<8x32xf32>
    %cst_36 = arith.constant 1.000000e+00 : f32
    %72 = vector.broadcast %cst_36 : f32 to vector<8x32xf32>
    %73 = arith.divf %72, %71 : vector<8x32xf32>
    %74 = vector.extract_strided_slice %53 {offsets = [0, 64], sizes = [8, 32], strides = [1, 1]} : vector<8x96xf32> to vector<8x32xf32>
    %75 = vector.extract_strided_slice %30 {offsets = [0, 64], sizes = [8, 32], strides = [1, 1]} : vector<8x96xf32> to vector<8x32xf32>
    %76 = arith.mulf %63, %75 : vector<8x32xf32>
    %77 = arith.addf %74, %76 : vector<8x32xf32>
    %78 = math.tanh %77 : vector<8x32xf32>
    %cst_37 = arith.constant 1.000000e+00 : f32
    %79 = vector.broadcast %cst_37 : f32 to vector<8x32xf32>
    %80 = arith.subf %79, %73 : vector<8x32xf32>
    %81 = arith.mulf %80, %78 : vector<8x32xf32>
    %82 = arith.mulf %73, %3 : vector<8x32xf32>
    %83 = arith.addf %81, %82 : vector<8x32xf32>
    %cst_38 = arith.constant dense<0.000000e+00> : vector<8x224xf32>
    %84 = tpu.matmul %83, %12, %cst_38 {dimension_numbers = #tpu.dot_dimension_numbers<[1], [0], [0], [1], [0, 0, 1, 1], [], []>, precision = #tpu.contract_precision<fp32>} : vector<8x32xf32>, vector<32x224xf32>, vector<8x224xf32> -> vector<8x224xf32>
    %85 = vector.extract_strided_slice %84 {offsets = [0, 0], sizes = [8, 128], strides = [1, 1]} : vector<8x224xf32> to vector<8x128xf32>
    %86 = arith.addf %20, %85 : vector<8x128xf32>
    %87 = vector.extract_strided_slice %86 {offsets = [0, 0], sizes = [8, 16], strides = [1, 1]} : vector<8x128xf32> to vector<8x16xf32>
    %88 = vector.extract_strided_slice %86 {offsets = [0, 16], sizes = [8, 16], strides = [1, 1]} : vector<8x128xf32> to vector<8x16xf32>
    %89 = vector.extract_strided_slice %86 {offsets = [0, 32], sizes = [8, 16], strides = [1, 1]} : vector<8x128xf32> to vector<8x16xf32>
    %90 = vector.extract_strided_slice %84 {offsets = [0, 128], sizes = [8, 96], strides = [1, 1]} : vector<8x224xf32> to vector<8x96xf32>
    %91 = vector.broadcast %14 : vector<1x96xf32> to vector<8x96xf32>
    %92 = arith.addf %90, %91 : vector<8x96xf32>
    %cst_39 = arith.constant dense<0.000000e+00> : vector<8x8xf32>
    %93 = tpu.matmul %89, %88, %cst_39 {dimension_numbers = #tpu.dot_dimension_numbers<[1], [1], [0], [0], [0, 0, 1, 0], [], []>, precision = #tpu.contract_precision<fp32>} : vector<8x16xf32>, vector<8x16xf32>, vector<8x8xf32> -> vector<8x8xf32>
    %94 = arith.addf %93, %11 : vector<8x8xf32>
    %cst_40 = arith.constant dense<0xFF800000> : vector<8xf32>
    %95 = vector.multi_reduction <maximumf>, %94, %cst_40 [1] : vector<8x8xf32> to vector<8xf32>
    %96 = vector.shape_cast %95 : vector<8xf32> to vector<8x1xf32>
    %cst_41 = arith.constant -1.000000e+29 : f32
    %97 = vector.broadcast %cst_41 : f32 to vector<8x1xf32>
    %98 = arith.cmpf olt, %96, %97 : vector<8x1xf32>
    %cst_42 = arith.constant 0.000000e+00 : f32
    %99 = vector.broadcast %cst_42 : f32 to vector<8x1xf32>
    %100 = arith.select %98, %99, %96 : vector<8x1xi1>, vector<8x1xf32>
    %101 = vector.broadcast %100 : vector<8x1xf32> to vector<8x8xf32>
    %102 = arith.subf %94, %101 : vector<8x8xf32>
    %103 = math.exp %102 : vector<8x8xf32>
    %cst_43 = arith.constant dense<0.000000e+00> : vector<8xf32>
    %104 = vector.multi_reduction <add>, %103, %cst_43 [1] : vector<8x8xf32> to vector<8xf32>
    %105 = vector.shape_cast %104 : vector<8xf32> to vector<8x1xf32>
    %cst_44 = arith.constant 0.000000e+00 : f32
    %106 = vector.broadcast %cst_44 : f32 to vector<8x1xf32>
    %107 = arith.cmpf oeq, %105, %106 : vector<8x1xf32>
    %cst_45 = arith.constant 1.000000e+00 : f32
    %108 = vector.broadcast %cst_45 : f32 to vector<8x1xf32>
    %109 = arith.select %107, %108, %105 : vector<8x1xi1>, vector<8x1xf32>
    %110 = tpu.reciprocal %109 {approx = true} : vector<8x1xf32> -> vector<8x1xf32>
    %111 = vector.broadcast %110 : vector<8x1xf32> to vector<8x8xf32>
    %112 = arith.mulf %103, %111 : vector<8x8xf32>
    %cst_46 = arith.constant dense<0.000000e+00> : vector<8x16xf32>
    %113 = tpu.matmul %112, %87, %cst_46 {dimension_numbers = #tpu.dot_dimension_numbers<[1], [0], [0], [1], [0, 0, 1, 1], [], []>, precision = #tpu.contract_precision<fp32>} : vector<8x8xf32>, vector<8x16xf32>, vector<8x16xf32> -> vector<8x16xf32>
    %cst_47 = arith.constant dense<0.000000e+00> : vector<8x96xf32>
    %114 = tpu.matmul %113, %13, %cst_47 {dimension_numbers = #tpu.dot_dimension_numbers<[1], [0], [0], [1], [0, 0, 1, 1], [], []>, precision = #tpu.contract_precision<fp32>} : vector<8x16xf32>, vector<16x96xf32>, vector<8x96xf32> -> vector<8x96xf32>
    %115 = arith.addf %21, %114 : vector<8x96xf32>
    %116 = vector.extract_strided_slice %115 {offsets = [0, 0], sizes = [8, 32], strides = [1, 1]} : vector<8x96xf32> to vector<8x32xf32>
    %117 = vector.extract_strided_slice %92 {offsets = [0, 0], sizes = [8, 32], strides = [1, 1]} : vector<8x96xf32> to vector<8x32xf32>
    %118 = arith.addf %116, %117 : vector<8x32xf32>
    %cst_48 = arith.constant 0.000000e+00 : f32
    %119 = vector.broadcast %cst_48 : f32 to vector<8x32xf32>
    %120 = arith.subf %119, %118 : vector<8x32xf32>
    %121 = math.exp %120 : vector<8x32xf32>
    %cst_49 = arith.constant 1.000000e+00 : f32
    %122 = vector.broadcast %cst_49 : f32 to vector<8x32xf32>
    %123 = arith.addf %122, %121 : vector<8x32xf32>
    %cst_50 = arith.constant 1.000000e+00 : f32
    %124 = vector.broadcast %cst_50 : f32 to vector<8x32xf32>
    %125 = arith.divf %124, %123 : vector<8x32xf32>
    %126 = vector.extract_strided_slice %115 {offsets = [0, 32], sizes = [8, 32], strides = [1, 1]} : vector<8x96xf32> to vector<8x32xf32>
    %127 = vector.extract_strided_slice %92 {offsets = [0, 32], sizes = [8, 32], strides = [1, 1]} : vector<8x96xf32> to vector<8x32xf32>
    %128 = arith.addf %126, %127 : vector<8x32xf32>
    %cst_51 = arith.constant 0.000000e+00 : f32
    %129 = vector.broadcast %cst_51 : f32 to vector<8x32xf32>
    %130 = arith.subf %129, %128 : vector<8x32xf32>
    %131 = math.exp %130 : vector<8x32xf32>
    %cst_52 = arith.constant 1.000000e+00 : f32
    %132 = vector.broadcast %cst_52 : f32 to vector<8x32xf32>
    %133 = arith.addf %132, %131 : vector<8x32xf32>
    %cst_53 = arith.constant 1.000000e+00 : f32
    %134 = vector.broadcast %cst_53 : f32 to vector<8x32xf32>
    %135 = arith.divf %134, %133 : vector<8x32xf32>
    %136 = vector.extract_strided_slice %115 {offsets = [0, 64], sizes = [8, 32], strides = [1, 1]} : vector<8x96xf32> to vector<8x32xf32>
    %137 = vector.extract_strided_slice %92 {offsets = [0, 64], sizes = [8, 32], strides = [1, 1]} : vector<8x96xf32> to vector<8x32xf32>
    %138 = arith.mulf %125, %137 : vector<8x32xf32>
    %139 = arith.addf %136, %138 : vector<8x32xf32>
    %140 = math.tanh %139 : vector<8x32xf32>
    %cst_54 = arith.constant 1.000000e+00 : f32
    %141 = vector.broadcast %cst_54 : f32 to vector<8x32xf32>
    %142 = arith.subf %141, %135 : vector<8x32xf32>
    %143 = arith.mulf %142, %140 : vector<8x32xf32>
    %144 = arith.mulf %135, %83 : vector<8x32xf32>
    %145 = arith.addf %143, %144 : vector<8x32xf32>
    %c0_55 = arith.constant 0 : index
    %c0_56 = arith.constant 0 : index
    %c0_57 = arith.constant 0 : index
    %146 = vector.load %arg9[%c0_55, %c0_56, %c0_57] : memref<1x8x32xf32, #tpu.memory_space<vmem>>, vector<1x8x32xf32>
    %147 = vector.shape_cast %146 : vector<1x8x32xf32> to vector<8x32xf32>
    %148 = vector.shape_cast %145 : vector<8x32xf32> to vector<1x8x32xf32>
    tpu.vector_store %arg9[%c0_55, %c0_56, %c0_57], %148 {strides = array<i32>} : memref<1x8x32xf32, #tpu.memory_space<vmem>>, vector<1x8x32xf32>,
    return
  }
  func.func @transform_0(%arg0: i32) -> (i32, i32, i32) {
    %c0_i32 = arith.constant 0 : i32
    %c0_i32_0 = arith.constant 0 : i32
    %c0_i32_1 = arith.constant 0 : i32
    return %arg0, %c0_i32, %c0_i32_0 : i32, i32, i32
  }
  func.func @transform_1(%arg0: i32) -> (i32, i32, i32) {
    %c0_i32 = arith.constant 0 : i32
    %c0_i32_0 = arith.constant 0 : i32
    %c0_i32_1 = arith.constant 0 : i32
    return %arg0, %c0_i32, %c0_i32_0 : i32, i32, i32
  }
  func.func @transform_2(%arg0: i32) -> (i32, i32, i32) {
    %c0_i32 = arith.constant 0 : i32
    %c0_i32_0 = arith.constant 0 : i32
    %c0_i32_1 = arith.constant 0 : i32
    return %arg0, %c0_i32, %c0_i32_0 : i32, i32, i32
  }
  func.func @transform_3(%arg0: i32) -> (i32, i32) {
    %c0_i32 = arith.constant 0 : i32
    %c0_i32_0 = arith.constant 0 : i32
    %c0_i32_1 = arith.constant 0 : i32
    return %c0_i32, %c0_i32_0 : i32, i32
  }
  func.func @transform_4(%arg0: i32) -> (i32, i32) {
    %c0_i32 = arith.constant 0 : i32
    %c0_i32_0 = arith.constant 0 : i32
    %c0_i32_1 = arith.constant 0 : i32
    return %c0_i32, %c0_i32_0 : i32, i32
  }
  func.func @transform_5(%arg0: i32) -> (i32, i32) {
    %c0_i32 = arith.constant 0 : i32
    %c0_i32_0 = arith.constant 0 : i32
    %c0_i32_1 = arith.constant 0 : i32
    return %c0_i32, %c0_i32_0 : i32, i32
  }
  func.func @transform_6(%arg0: i32) -> (i32, i32) {
    %c0_i32 = arith.constant 0 : i32
    %c0_i32_0 = arith.constant 0 : i32
    %c0_i32_1 = arith.constant 0 : i32
    return %c0_i32, %c0_i32_0 : i32, i32
  }
  func.func @transform_7(%arg0: i32) -> (i32, i32) {
    %c0_i32 = arith.constant 0 : i32
    %c0_i32_0 = arith.constant 0 : i32
    %c0_i32_1 = arith.constant 0 : i32
    return %c0_i32, %c0_i32_0 : i32, i32
  }
  func.func @transform_8(%arg0: i32) -> (i32, i32, i32) {
    %c0_i32 = arith.constant 0 : i32
    %c0_i32_0 = arith.constant 0 : i32
    %c0_i32_1 = arith.constant 0 : i32
    return %arg0, %c0_i32, %c0_i32_0 : i32, i32, i32
  }
}

</mosaic_0001>

<bundles_post_ra>
// kernel: tarmac_forward.1
= control target key start
LH: loop header
LB: loop body
LE: loop exit
PB: predicated region body
PF: predicated region fallthrough
CT: control target
= control target key end

     0   :  { %s5322_s27 = smov 0   ;;  %s6032_s0 = inlined_call_operand.vmem [shape: f32[2,8,32], index: 0, kind: input, shape index: {}]   ;;  %s6033_s1 = inlined_call_operand.vmem [shape: f32[2,8,32], index: 1, kind: input, shape index: {}, may-alias: {1,8}]   ;;  %s6034_s2 = inlined_call_operand.vmem [shape: s8[2,8,8], index: 2, kind: input, shape index: {}]   ;;  %s6035_s3 = inlined_call_operand.vmem [shape: f32[32,224], index: 3, kind: input, shape index: {}]   ;;  %s6036_s4 = inlined_call_operand.vmem [shape: f32[1,224], index: 4, kind: input, shape index: {}]   ;;  %s6037_s5 = inlined_call_operand.vmem [shape: f32[32,224], index: 5, kind: input, shape index: {}]   ;;  %s6038_s6 = inlined_call_operand.vmem [shape: f32[1,96], index: 6, kind: input, shape index: {}]   ;;  %s6039_s7 = inlined_call_operand.vmem [shape: f32[16,96], index: 7, kind: input, shape index: {}]   ;;  %s6040_s8 = inlined_call_operand.vmem [shape: f32[2,8,32], index: 8, kind: output, shape index: {}, may-alias: {1,8}]  }
   0x1 LB: > { %s4927_s28 = sadd.s32 4294967295, %s5268_s27   ;;  %p4931_p0 = scmp.ge.s32.totalorder %s5268_s27, 1  ;;  %s5268_s27 = sphi %s5322_s27, %s18_s27  }
   0x2   : > { %p279_p1 = scmp.lt.s32.totalorder %s5268_s27, 3 }
   0x4   : > { %p280_p2 = pnand %p4931_p0, %p279_p1 }
   0x6   : > { %283 = sbr.rel (%p280_p2) target bundleno = 3483 (0xd9b), region = 52 }
   0xb   : > { %v360_v0 = vld [vmem:[%s6035_s3 + $0x38] sm:$0xff]  ;;  %v359_v1 = vld [vmem:[%s6035_s3 + $0x30] sm:$0xff]  ;;  %v358_v2 = vld [vmem:[%s6035_s3 + $0x28] sm:$0xff]  ;;  %p5339_p3 = scmp.lt.s32.totalorder %s4927_s28, 1  ;;  %vm373_vm0 = vcmask 261120   ;;  %v6042_v9 = vmov 0.0  }
   0xc   : > { %v5343_v3 = vand.u32 4294901760, %v360_v0  ;;  %v5345_v4 = vand.u32 4294901760, %v359_v1  ;;  %v5347_v5 = vand.u32 4294901760, %v358_v2  ;;  %v357_v6 = vld [vmem:[%s6035_s3 + $0x20] sm:$0xff]  ;;  %v356_v7 = vld [vmem:[%s6035_s3 + $0x18] sm:$0xff]  ;;  %v355_v8 = vld [vmem:[%s6035_s3 + $0x10] sm:$0xff]  ;;  %449 = vmatprep.mubr.f32.mxu0 %v6042_v9  ;;  %565 = vmatprep.mubr.f32.mxu1 %v6042_v9 }
   0xd   : > { %v5360_v10 = vand.u32 4294901760, %v357_v6  ;;  %v5362_v11 = vand.u32 4294901760, %v356_v7  ;;  %v5364_v12 = vand.u32 4294901760, %v355_v8  ;;  %v354_v13 = vld [vmem:[%s6035_s3 + $0x8] sm:$0xff]  ;;  %v353_v14 = vld [vmem:[%s6035_s3] sm:$0xff]  ;;  %s6052_s28 = smov (!%p5339_p3, %s4927_s28), 1 }
   0xe   : > { %402 = vmatprep.subr.mxu0 %v5343_v3  ;;  %v5378_v15 = vsub.f32 %v360_v0, %v5343_v3  ;;  %v5381_v16 = vsub.f32 %v359_v1, %v5345_v4  ;;  %v5384_v17 = vsub.f32 %v358_v2, %v5347_v5  ;;  %v5386_v18 = vand.u32 4294901760, %v354_v13  ;;  %s5401_s24 = sshll.u32 %s6052_s28, 3  ;;  %v349_v56 = vld [vmem:[%s6037_s5 + $0x38] sm:$0xff]  ;;  %v348_v57 = vld [vmem:[%s6037_s5 + $0x30] sm:$0xff]  ;;  %v347_v58 = vld [vmem:[%s6037_s5 + $0x28] sm:$0xff]  ;;  %s5273_s13 = smov 96  }
   0xf   : > { %404 = vmatpush1.msra.mxu0 %v5345_v4  ;;  %v5390_v19 = vsub.f32 %v357_v6, %v5360_v10  ;;  %v5393_v20 = vsub.f32 %v356_v7, %v5362_v11  ;;  %v5395_v21 = vand.u32 4294901760, %v353_v14  ;;  %v5398_v22 = vsub.f32 %v355_v8, %v5364_v12  ;;  %s322_s29 = scalar_lea.vmem %s6032_s0, %s5401_s24  ;;  %s326_s10 = scalar_lea.vmem %s6033_s1, %s5401_s24  ;;  %v346_v60 = vld [vmem:[%s6037_s5 + $0x20] sm:$0xff]  ;;  %v345_v63 = vld [vmem:[%s6037_s5 + $0x18] sm:$0xff]  ;;  %v344_v1 = vld [vmem:[%s6037_s5 + $0x10] sm:$0xff] }
  0x10   : > { %406 = vmatprep.subr.mxu0 %v5347_v5  ;;  %v487_v23 = vand.u32 4294901760, %v5378_v15  ;;  %v493_v24 = vand.u32 4294901760, %v5381_v16  ;;  %v499_v25 = vand.u32 4294901760, %v5384_v17  ;;  %v5408_v26 = vsub.f32 %v354_v13, %v5386_v18  ;;  %v335_v30 = vld [vmem:[%s322_s29] sm:$0xff]  ;;  %v343_v6 = vld [vmem:[%s6037_s5 + $0x8] sm:$0xff]  ;;  %s5274_s14 = smov 64   ;;  %s334_s26 = scalar_lea.vmem %s6040_s8, %s5401_s24 }
  0x11   : > { %408 = vmatpush1.msra.mxu0 %v5360_v10  ;;  %v505_v27 = vand.u32 4294901760, %v5390_v19  ;;  %v511_v28 = vand.u32 4294901760, %v5393_v20  ;;  %v517_v29 = vand.u32 4294901760, %v5398_v22  ;;  %v5419_v31 = vsub.f32 %v353_v14, %v5395_v21  ;;  %v5479_v61 = vld [vmem:[%s326_s10] sm:$0xff]  ;;  %s5271_s10 = smov 112   ;;  %s4934_s15 = sshll.u32 %s6052_s28, 1 }
  0x12   : > { %v488_v32 = vsub.f32 %v5378_v15, %v487_v23  ;;  %v494_v33 = vsub.f32 %v5381_v16, %v493_v24  ;;  %410 = vmatprep.subr.mxu0 %v5362_v11  ;;  %v500_v34 = vsub.f32 %v5384_v17, %v499_v25  ;;  %v523_v35 = vand.u32 4294901760, %v5408_v26  ;;  %v342_v14 = vld [vmem:[%s6037_s5] sm:$0xff]  ;;  %s330_s18 = scalar_lea.vmem %s6034_s2, %s4934_s15  ;;  %s5276_s22 = smov 32  }
  0x13   : > { %412 = vmatpush1.msra.mxu0 %v5364_v12  ;;  %v506_v36 = vsub.f32 %v5390_v19, %v505_v27  ;;  %v512_v37 = vsub.f32 %v5393_v20, %v511_v28  ;;  %v518_v38 = vsub.f32 %v5398_v22, %v517_v29  ;;  %v375_v39 = vsel %vm373_vm0, %v335_v30, 0 }
  0x14   : > { %v489_v40 = vand.u32 4294901760, %v488_v32  ;;  %v495_v41 = vand.u32 4294901760, %v494_v33  ;;  %v501_v42 = vand.u32 4294901760, %v500_v34  ;;  %414 = vmatprep.subr.mxu0 %v5386_v18  ;;  %v524_v43 = vsub.f32 %v5408_v26, %v523_v35 }
  0x15   : > { %v507_v44 = vand.u32 4294901760, %v506_v36  ;;  %416 = vmatpush1.msra.mxu0 %v5395_v21  ;;  %v5448_v45 = vand.u32 4294901760, %v375_v39  ;;  %v513_v46 = vand.u32 4294901760, %v512_v37  ;;  %v529_v47 = vand.u32 4294901760, %v5419_v31 }
  0x16   : > { %490 = vmatprep.subr.mxu1 %v489_v40  ;;  %599 = vmatprep.subr.mxu0 %v5378_v15  ;;  %v519_v48 = vand.u32 4294901760, %v518_v38  ;;  %v525_v50 = vand.u32 4294901760, %v524_v43  ;;  %v5474_v59 = vand.u32 4294901760, %v349_v56  ;;  %v5483_v62 = vand.u32 4294901760, %v348_v57 }
  0x17   : > { %496 = vmatpush1.msra.mxu1 %v495_v41  ;;  %v451_v49 = vsub.f32 %v375_v39, %v5448_v45  ;;  %v530_v51 = vsub.f32 %v5419_v31, %v529_v47  ;;  %v5490_v0 = vand.u32 4294901760, %v347_v58  ;;  %v5497_v2 = vand.u32 4294901760, %v346_v60 }
  0x18   : > { %502 = vmatprep.subr.mxu1 %v501_v42  ;;  %v921_v7 = vsel %vm373_vm0, %v5479_v61, 0  ;;  %v5507_v8 = vsub.f32 %v349_v56, %v5474_v59  ;;  %v5509_v13 = vand.u32 4294901760, %v345_v63  ;;  %v5517_v30 = vsub.f32 %v348_v57, %v5483_v62 }
  0x19   : > { %508 = vmatpush1.msra.mxu1 %v507_v44  ;;  %v452_v52 = vand.u32 4294901760, %v451_v49  ;;  %v531_v53 = vand.u32 4294901760, %v530_v51  ;;  %v5519_v32 = vand.u32 4294901760, %v344_v1  ;;  %v5524_v33 = vsub.f32 %v347_v58, %v5490_v0  ;;  %v361_v51 = vld [vmem:[%s6036_s4] sm:$0x3] }
  0x1a   : > { %514 = vmatprep.subr.mxu1 %v513_v46  ;;  %v5526_v34 = vand.u32 4294901760, %v343_v6  ;;  %v5528_v36 = vand.u32 4294901760, %v921_v7  ;;  %v5533_v37 = vsub.f32 %v346_v60, %v5497_v2  ;;  %v5535_v38 = vand.u32 4294901760, %v342_v14 }
  0x1b   : > { %520 = vmatpush1.msra.mxu1 %v519_v48  ;;  %v453_v54 = vsub.f32 %v451_v49, %v452_v52  ;;  %v5541_v39 = vand.u32 4294901760, %v5507_v8  ;;  %v5544_v40 = vsub.f32 %v345_v63, %v5509_v13  ;;  %v5549_v15 = vand.u32 4294901760, %v5517_v30 }
  0x1c   : > { %526 = vmatprep.subr.mxu1 %v525_v50  ;;  %v363_v48 = vlaneseq  ;;  %vm5272_vm1 = vmmov 0   ;;  %vm1479_vm2 = vcmask 130048   ;;  %vm1930_vm4 = vcmask 64512  }
  0x1d   : > { %v454_v55 = vand.u32 4294901760, %v453_v54  ;;  %532 = vmatpush1.msra.mxu1 %v531_v53 }
  0x1e   : > { %567 = vmatmul.mubr.f32.vlgmr.msra.gmra.mxu1 %v5448_v45  ;;  %687 = vmatprep.subr.mxu1 %v5343_v3 }
  0x1f   : > { %455 = vmatmul.mubr.f32.vlgmr.msra.gmra.mxu0 %v454_v55  ;;  %689 = vmatpush1.msra.mxu1 %v5345_v4 }
  0x20   : > { %602 = vmatpush1.msra.mxu0 %v5381_v16  ;;  %691 = vmatprep.subr.mxu1 %v5347_v5  ;;  %v5558_v16 = vand.u32 4294901760, %v5524_v33 }
  0x21   : > { %605 = vmatprep.subr.mxu0 %v5384_v17  ;;  %693 = vmatpush1.msra.mxu1 %v5360_v10  ;;  %v5564_v17 = vsub.f32 %v343_v6, %v5526_v34 }
  0x22   : > { %608 = vmatpush1.msra.mxu0 %v5390_v19  ;;  %695 = vmatprep.subr.mxu1 %v5362_v11  ;;  %v1034_v19 = vsub.f32 %v5507_v8, %v5541_v39 }
  0x23   : > { %611 = vmatprep.subr.mxu0 %v5393_v20  ;;  %653 = vmatprep.mubr.f32.mxu0 %v6042_v9 }
  0x24   : > { %614 = vmatpush1.msra.mxu0 %v5398_v22  ;;  %697 = vmatpush1.msra.mxu1 %v5364_v12 }
  0x25   : > { %617 = vmatprep.subr.mxu0 %v5408_v26  ;;  %699 = vmatprep.subr.mxu1 %v5386_v18 }
  0x26   : > { %620 = vmatpush1.msra.mxu0 %v5419_v31  ;;  %701 = vmatpush1.msra.mxu1 %v5395_v21 }
  0x27   : > { %656 = vmatmul.mubr.f32.vlgmr.msra.gmra.mxu0 %v451_v49  ;;  %771 = vmatprep.subr.mxu0 %v487_v23  ;;  %v5552_v23 = vsub.f32 %v344_v1, %v5519_v32  ;;  %v364_v49 = vshrl.u32 %v363_v48, 7 }
  0x28   : > { %734 = vmatprep.mubr.f32.mxu1 %v6042_v9  ;;  %775 = vmatpush1.msra.mxu0 %v493_v24  ;;  %v5561_v24 = vsub.f32 %v921_v7, %v5528_v36 }
  0x29   : > { %738 = vmatmul.mubr.f32.vlgmr.msra.gmra.mxu1 %v452_v52  ;;  %779 = vmatprep.subr.mxu0 %v499_v25  ;;  %v5570_v25 = vand.u32 4294901760, %v5533_v37  ;;  %v5589_v20 = vand.u32 4294901760, %v5552_v23  ;;  %v369_v50 = vsub.s32 1, %v364_v49 }
  0x2a   : > { %865 = vmatprep.subr.mxu1 %v5343_v3  ;;  %783 = vmatpush1.msra.mxu0 %v505_v27  ;;  %v5573_v3 = vsub.f32 %v342_v14, %v5535_v38  ;;  %v5581_v27 = vand.u32 4294901760, %v5544_v40  ;;  %v998_v22 = vand.u32 4294901760, %v5561_v24 }
  0x2b   : > { %867 = vmatpush1.msra.mxu1 %v5345_v4  ;;  %787 = vmatprep.subr.mxu0 %v511_v28  ;;  %v1040_v4 = vsub.f32 %v5517_v30, %v5549_v15  ;;  %v1052_v26 = vsub.f32 %v5533_v37, %v5570_v25  ;;  %v5609_v28 = vand.u32 4294901760, %v1034_v19  ;;  %v1064_v31 = vsub.f32 %v5552_v23, %v5589_v20 }
  0x2c   : > { %869 = vmatprep.subr.mxu1 %v5347_v5  ;;  %791 = vmatpush1.msra.mxu0 %v517_v29  ;;  %v1046_v5 = vsub.f32 %v5524_v33, %v5558_v16  ;;  %v1058_v29 = vsub.f32 %v5544_v40, %v5581_v27  ;;  %v370_v52 = vrot.slane %v361_v51, %v369_v50 }
  0x2d   : > { %871 = vmatpush1.msra.mxu1 %v5360_v10  ;;  %795 = vmatprep.subr.mxu0 %v523_v35  ;;  %v5598_v10 = vand.u32 4294901760, %v5564_v17  ;;  %v5640_v44 = vand.u32 4294901760, %v1064_v31 }
  0x2e   : > { %873 = vmatprep.subr.mxu1 %v5362_v11  ;;  %799 = vmatpush1.msra.mxu0 %v529_v47  ;;  %v5605_v11 = vand.u32 4294901760, %v5573_v3  ;;  %v5621_v35 = vand.u32 4294901760, %v1046_v5  ;;  %v5636_v43 = vand.u32 4294901760, %v1058_v29 }
  0x2f   : > { %832 = vmatprep.mubr.f32.mxu0 %v6042_v9  ;;  %875 = vmatpush1.msra.mxu1 %v5364_v12  ;;  %v5615_v12 = vand.u32 4294901760, %v1040_v4  ;;  %v1070_v41 = vsub.f32 %v5564_v17, %v5598_v10 }
  0x30   : > { %834 = vmatmul.mubr.f32.vlgmr.msra.gmra.mxu0 %v5448_v45  ;;  %877 = vmatprep.subr.mxu1 %v5386_v18  ;;  %v999_v18 = vsub.f32 %v5561_v24, %v998_v22  ;;  %v1076_v42 = vsub.f32 %v5573_v3, %v5605_v11 }
  0x31   : > { %948 = vmatprep.subr.mxu0 %v5474_v59  ;;  %879 = vmatpush1.msra.mxu1 %v5395_v21  ;;  %v5630_v21 = vand.u32 4294901760, %v1052_v26  ;;  %v5644_v46 = vand.u32 4294901760, %v1070_v41  ;;  %v365_v26 = vsub.s32 0, %v364_v49 }
  0x32   : > { %912 = vmatprep.mubr.f32.mxu1 %v6042_v9  ;;  %950 = vmatpush1.msra.mxu0 %v5483_v62  ;;  %v5648_v47 = vand.u32 4294901760, %v1076_v42 }
  0x33   : > { %914 = vmatmul.mubr.f32.vlgmr.msra.gmra.mxu1 %v5448_v45  ;;  %952 = vmatprep.subr.mxu0 %v5490_v0  ;;  %v1000_v45 = vand.u32 4294901760, %v999_v18  ;;  %v366_v29 = vrot.slane %v361_v51, %v365_v26 }
  0x34   : > { %1036 = vmatprep.subr.mxu1 %v5609_v28  ;;  %954 = vmatpush1.msra.mxu0 %v5497_v2 }
  0x35   : > { %1042 = vmatpush1.msra.mxu1 %v5615_v12  ;;  %956 = vmatprep.subr.mxu0 %v5509_v13 }
  0x36   : > { %1048 = vmatprep.subr.mxu1 %v5621_v35  ;;  %958 = vmatpush1.msra.mxu0 %v5519_v32 }
  0x37   : > { %1054 = vmatpush1.msra.mxu1 %v5630_v21  ;;  %960 = vmatprep.subr.mxu0 %v5526_v34 }
  0x38   : > { %1060 = vmatprep.subr.mxu1 %v5636_v43  ;;  %962 = vmatpush1.msra.mxu0 %v5535_v38 }
  0x39   : > { %995 = vmatprep.mubr.f32.mxu0 %v6042_v9  ;;  %1066 = vmatpush1.msra.mxu1 %v5640_v44 }
  0x3a   : > { %1001 = vmatmul.mubr.f32.vlgmr.msra.gmra.mxu0 %v1000_v45  ;;  %1072 = vmatprep.subr.mxu1 %v5644_v46 }
  0x3b   : > { %1145 = vmatprep.subr.mxu0 %v5507_v8  ;;  %1078 = vmatpush1.msra.mxu1 %v5648_v47 }
  0x3c   : > { %1111 = vmatprep.mubr.f32.mxu1 %v6042_v9  ;;  %1148 = vmatpush1.msra.mxu0 %v5517_v30 }
  0x3d   : > { %1113 = vmatmul.mubr.f32.vlgmr.msra.gmra.mxu1 %v5528_v36  ;;  %1151 = vmatprep.subr.mxu0 %v5524_v33 }
  0x3e   : > { %1233 = vmatprep.subr.mxu1 %v5474_v59  ;;  %1154 = vmatpush1.msra.mxu0 %v5533_v37 }
  0x3f   : > { %1235 = vmatpush1.msra.mxu1 %v5483_v62  ;;  %1157 = vmatprep.subr.mxu0 %v5544_v40 }
  0x40   : > { %1237 = vmatprep.subr.mxu1 %v5490_v0  ;;  %1160 = vmatpush1.msra.mxu0 %v5552_v23 }
  0x41   : > { %1239 = vmatpush1.msra.mxu1 %v5497_v2  ;;  %1163 = vmatprep.subr.mxu0 %v5564_v17 }
  0x42   : > { %1241 = vmatprep.subr.mxu1 %v5509_v13  ;;  %1166 = vmatpush1.msra.mxu0 %v5573_v3 }
  0x43   : > { %1199 = vmatprep.mubr.f32.mxu0 %v6042_v9  ;;  %1243 = vmatpush1.msra.mxu1 %v5519_v32 }
  0x44   : > { %1202 = vmatmul.mubr.f32.vlgmr.msra.gmra.mxu0 %v5561_v24  ;;  %1245 = vmatprep.subr.mxu1 %v5526_v34 }
  0x45   : > { %1317 = vmatprep.subr.mxu0 %v5541_v39  ;;  %1247 = vmatpush1.msra.mxu1 %v5535_v38 }
  0x46   : > { %1280 = vmatprep.mubr.f32.mxu1 %v6042_v9  ;;  %1321 = vmatpush1.msra.mxu0 %v5549_v15 }
  0x47   : > { %1284 = vmatmul.mubr.f32.vlgmr.msra.gmra.mxu1 %v998_v22  ;;  %1325 = vmatprep.subr.mxu0 %v5558_v16 }
  0x48   : > { %1411 = vmatprep.subr.mxu1 %v5474_v59  ;;  %1329 = vmatpush1.msra.mxu0 %v5570_v25 }
  0x49   : > { %1413 = vmatpush1.msra.mxu1 %v5483_v62  ;;  %1333 = vmatprep.subr.mxu0 %v5581_v27 }
  0x4a   : > { %1415 = vmatprep.subr.mxu1 %v5490_v0  ;;  %1337 = vmatpush1.msra.mxu0 %v5589_v20 }
  0x4b   : > { %1417 = vmatpush1.msra.mxu1 %v5497_v2  ;;  %1341 = vmatprep.subr.mxu0 %v5598_v10 }
  0x4c   : > { %1419 = vmatprep.subr.mxu1 %v5509_v13  ;;  %1345 = vmatpush1.msra.mxu0 %v5605_v11 }
  0x4d   : > { %1378 = vmatprep.mubr.f32.mxu0 %v6042_v9  ;;  %1421 = vmatpush1.msra.mxu1 %v5519_v32 }
  0x4e   : > { %1380 = vmatmul.mubr.f32.vlgmr.msra.gmra.mxu0 %v5528_v36  ;;  %1423 = vmatprep.subr.mxu1 %v5526_v34 }
  0x4f   : > { %1425 = vmatpush1.msra.mxu1 %v5535_v38  ;;  %1458 = vmatprep.mubr.f32.mxu1 %v6042_v9 }
  0x50   : > { %1460 = vmatmul.mubr.f32.vlgmr.msra.gmra.mxu1 %v5528_v36  ;;  %5023 = vmatprep.subr.mxu0 %v6042_v9 }
  0x51   : > { %5028 = vmatprep.subr.mxu1 %v6042_v9  ;;  %5030 = vmatprep.mubr.msk.f32.mxu1 %vm5272_vm1, %v6042_v9 }
  0x52   : > { %5025 = vmatprep.mubr.msk.f32.mxu0 %vm5272_vm1, %v6042_v9 }
  0xde   : > { %v568_v53 = vpop.f32.mrf.mxu1 }
  0xdf   : > { %v456_v54 = vpop.f32.mrf.mxu0 }
  0xe0   : > { %v570_v56 = vpop.f32.mrf.mxu1  ;;  %v457_v18 = vadd.f32 %v456_v54, %v366_v29 }
  0xe1   : > { %v458_v55 = vpop.f32.mrf.mxu0 }
  0xe2   : > { %v459_v57 = vadd.f32 %v458_v55, %v370_v52  ;;  %v569_v45 = vadd.f32 %v568_v53, %v457_v18 }
  0xe4   : > { %v571_v58 = vadd.f32 %v570_v56, %v459_v57 }
  0xe7   : > { %v657_v60 = vpop.f32.mrf.mxu0 }
  0xe8   : > { %v658_v50 = vadd.f32 %v657_v60, %v569_v45 }
  0xe9   : > { %v659_v63 = vpop.f32.mrf.mxu0  ;;  %v739_v1 = vpop.f32.mrf.mxu1 }
  0xea   : > { %v660_v6 = vadd.f32 %v659_v63, %v571_v58  ;;  %v740_v63 = vadd.f32 %v739_v1, %v658_v50 }
  0xeb   : > { %v741_v7 = vpop.f32.mrf.mxu1 }
  0xec   : > { %v742_v14 = vadd.f32 %v741_v7, %v660_v6 }
  0xf0   : > { %v835_v36 = vpop.f32.mrf.mxu0 }
  0xf1   : > { %v836_v7 = vadd.f32 %v835_v36, %v740_v63  ;;  %v5717_v36 = vld [vmem:[%s6038_s6] ss:$0 sm:$0xff] }
  0xf2   : > { %v837_v24 = vpop.f32.mrf.mxu0 }
  0xf3   : > { %v838_v19 = vadd.f32 %v837_v24, %v742_v14  ;;  %v915_v4 = vpop.f32.mrf.mxu1 }
  0xf4   : > { %v5706_v26 = vadd.f32 %v915_v4, %v836_v7 }
  0xf5   : > { %v917_v5 = vpop.f32.mrf.mxu1 }
  0xf6   : > { %v5704_v22 = vadd.f32 %v917_v5, %v838_v19 }
  0xfa   : > { %v1002_v31 = vpop.f32.mrf.mxu0 }
  0xfc   : > { %v1004_v41 = vpop.f32.mrf.mxu0 }
  0xfd   : > { %v1114_v42 = vpop.f32.mrf.mxu1 }
  0xfe   : > { %v1115_v52 = vadd.f32 %v1114_v42, %v1002_v31 }
  0xff   : > { %v1116_v55 = vpop.f32.mrf.mxu1 }
 0x100   : > { %v1117_v6 = vadd.f32 %v1116_v55, %v1004_v41 }
 0x104   : > { %v1203_v48 = vpop.f32.mrf.mxu0 }
 0x105   : > { %v1204_v56 = vadd.f32 %v1203_v48, %v1115_v52 }
 0x106   : > { %v1205_v57 = vpop.f32.mrf.mxu0 }
 0x107   : > { %v1285_v58 = vpop.f32.mrf.mxu1  ;;  %v1206_v14 = vadd.f32 %v1205_v57, %v1117_v6 }
 0x108   : > { %v1286_v24 = vadd.f32 %v1285_v58, %v1204_v56 }
 0x109   : > { %v1287_v19 = vpop.f32.mrf.mxu1 }
 0x10a   : > { %v1288_v53 = vadd.f32 %v1287_v19, %v1206_v14 }
 0x10e   : > { %v1381_v49 = vpop.f32.mrf.mxu0 }
 0x10f   : > { %v1382_v51 = vadd.f32 %v1381_v49, %v1286_v24 }
 0x110   : > { %v1383_v5 = vpop.f32.mrf.mxu0  ;;  %v1461_v54 = vpop.f32.mrf.mxu1 }
 0x111   : > { %v1462_v29 = vadd.f32 %v1461_v54, %v1382_v51  ;;  %v1384_v60 = vadd.f32 %v1383_v5, %v1288_v53  ;;  %v337_v54 = vld [vmem:[%s330_s18] sm:$0x3] }
 0x112   : > { %v1463_v18 = vpop.f32.mrf.mxu1  ;;  %v338_v53 = vunpack.c.0.s8 %v337_v54 }
 0x113   : > { %v1466_v31 = vadd.f32 %v1462_v29, %v5706_v26  ;;  %v1464_v1 = vadd.f32 %v1463_v18, %v1384_v60  ;;  %v5275_v60 = vmov -1e+30  }
 0x114   : > { %v339_v29 = vcvt.s32.f32 %v338_v53 }
 0x115   : > { %1477 = vrot.lane.b32.xlu0 %v1466_v31, %s5271_s10  ;;  %v5721_v4 = vadd.f32 %v5717_v36, %v1464_v1  ;;  %v5728_v57 = vand.u32 4294901760, %v1466_v31 }
 0x116   : > { %vm340_vm3 = vcmp.gt.f32.partialorder %v339_v29, 0.0 }
 0x117   : > { %v5731_v14 = vsub.f32 %v1466_v31, %v5728_v57 }
 0x119   : > { %1475 = vrot.lane.b32.xlu0 %v1466_v31, %s5273_s13  ;;  %v2058_v49 = vand.u32 4294901760, %v5731_v14  ;;  %v5761_v31 = vsel %vm340_vm3, 0.0, %v5275_v60 }
 0x11b   : > { %v2059_v51 = vsub.f32 %v5731_v14, %v2058_v49 }
 0x11d   : > { %2866 = vrot.lane.b32.xlu0 %v5721_v4, %s5274_s14  ;;  %v2060_v5 = vand.u32 4294901760, %v2059_v51 }
 0x187   : > { %v1478_v41 = vpop.permute.xlu0 %1477 }
 0x188   : > { %v1482_v42 = vsel %vm1479_vm2, %v1478_v41, 0 }
 0x189   : > { %v1515_v45 = vand.u32 4294901760, %v1482_v42 }
 0x18b   : > { %v1592_v48 = vsub.f32 %v1482_v42, %v1515_v45  ;;  %5024 = vmatpush3.xpose.msra.mxu0 %v1515_v45  ;;  %v1476_v50 = vpop.permute.xlu0 %1475 }
 0x18c   : > { %v1480_v52 = vsel %vm1479_vm2, %v1476_v50, 0  ;;  %5033 = vmatprep.subr.mxu0 %v6042_v9 }
 0x18d   : > { %v1593_v55 = vand.u32 4294901760, %v1592_v48  ;;  %v1550_v56 = vand.u32 4294901760, %v1480_v52 }
 0x18f   : > { %v1594_v58 = vsub.f32 %v1592_v48, %v1593_v55  ;;  %v1551_v63 = vsub.f32 %v1480_v52, %v1550_v56 }
 0x191   : > { %v1595_v6 = vand.u32 4294901760, %v1594_v58  ;;  %v1552_v7 = vand.u32 4294901760, %v1551_v63 }
 0x193   : > { %v1553_v24 = vsub.f32 %v1551_v63, %v1552_v7  ;;  %5029 = vmatpush3.xpose.msra.mxu1 %v1595_v6 }
 0x194   : > { %5038 = vmatprep.subr.mxu1 %v6042_v9 }
 0x195   : > { %v1554_v19 = vand.u32 4294901760, %v1553_v24 }
 0x196   : > { %5031 = vmatmul.mubr.f32.vlgmr.msra.gmra.mxu1 %v1550_v56 }
 0x197   : > { %5026 = vmatmul.mubr.f32.vlgmr.msra.gmra.mxu0 %v1554_v19  ;;  %5039 = vmatpush3.xpose.msra.mxu1 %v1515_v45 }
 0x198   : > { %5034 = vmatpush3.xpose.msra.mxu0 %v1592_v48  ;;  %5040 = vmatprep.mubr.msk.f32.mxu1 %vm5272_vm1, %v6042_v9 }
 0x199   : > { %5035 = vmatprep.mubr.msk.f32.mxu0 %vm5272_vm1, %v6042_v9  ;;  %5043 = vmatprep.subr.mxu0 %v6042_v9 }
 0x19a   : > { %5041 = vmatmul.mubr.f32.vlgmr.msra.gmra.mxu1 %v1552_v7  ;;  %5048 = vmatprep.subr.mxu1 %v6042_v9 }
 0x19b   : > { %5036 = vmatmul.mubr.f32.vlgmr.msra.gmra.mxu0 %v1551_v63  ;;  %5049 = vmatpush3.xpose.msra.mxu1 %v1515_v45 }
 0x19c   : > { %5044 = vmatpush3.xpose.msra.mxu0 %v1593_v55  ;;  %5050 = vmatprep.mubr.msk.f32.mxu1 %vm5272_vm1, %v6042_v9 }
 0x19d   : > { %5045 = vmatprep.mubr.msk.f32.mxu0 %vm5272_vm1, %v6042_v9  ;;  %5053 = vmatprep.subr.mxu0 %v6042_v9 }
 0x19e   : > { %5051 = vmatmul.mubr.f32.vlgmr.msra.gmra.mxu1 %v1550_v56  ;;  %5058 = vmatprep.subr.mxu1 %v6042_v9 }
 0x19f   : > { %5046 = vmatmul.mubr.f32.vlgmr.msra.gmra.mxu0 %v1550_v56  ;;  %5059 = vmatpush3.msra.mxu1 %v2060_v5 }
 0x1a0   : > { %5054 = vmatpush3.msra.mxu0 %v5728_v57  ;;  %5060 = vmatprep.mubr.msk.f32.mxu1 %vm5272_vm1, %v6042_v9 }
 0x1a1   : > { %5068 = vmatprep.subr.mxu1 %v6042_v9  ;;  %5055 = vmatprep.mubr.msk.f32.mxu0 %vm5272_vm1, %v6042_v9 }
 0x1a2   : > { %5063 = vmatprep.subr.mxu0 %v6042_v9 }
 0x256   : > { %v1632_v18 = vpop.f32.mrf.mxu1 }
 0x257   : > { %v1556_v1 = vpop.f32.mrf.mxu0 }
 0x258   : > { %v1557_v41 = vadd.f32 %v1556_v1, %v5761_v31  ;;  %v5032_v42 = vpop.f32.mrf.mxu1 }
 0x259   : > { %v5027_v45 = vpop.f32.mrf.mxu0 }
 0x25a   : > { %v1780_v48 = vpop.f32.mrf.mxu1  ;;  %v1633_v50 = vadd.f32 %v1632_v18, %v1557_v41 }
 0x25b   : > { %v1706_v52 = vpop.f32.mrf.mxu0 }
 0x25c   : > { %v1707_v55 = vadd.f32 %v1706_v52, %v1633_v50  ;;  %v5042_v56 = vpop.f32.mrf.mxu1 }
 0x25d   : > { %v5037_v58 = vpop.f32.mrf.mxu0 }
 0x25e   : > { %v1926_v63 = vpop.f32.mrf.mxu1  ;;  %v1781_v6 = vadd.f32 %v1780_v48, %v1707_v55 }
 0x25f   : > { %v1854_v7 = vpop.f32.mrf.mxu0 }
 0x260   : > { %v1855_v24 = vadd.f32 %v1854_v7, %v1781_v6  ;;  %v5052_v19 = vpop.f32.mrf.mxu1 }
 0x261   : > { %v5047_v51 = vpop.f32.mrf.mxu0 }
 0x262   : > { %v1927_v5 = vadd.f32 %v1926_v63, %v1855_v24 }
 0x264   : > { %v1931_v54 = vsel %vm1930_vm4, %v1927_v5, -inf }
 0x265   : > { %1932 = vmax.xlane.f32.xlu1 %v1931_v54 }
 0x2ee   : > { %v1933_v53 = vpop.xlane.xlu1 %1932 }
 0x2ef   : > { %vm1934_vm5 = vcmp.lt.f32.partialorder %v1933_v53, -1e+29 }
 0x2f0   : > { %v1935_v29 = vsel %vm1934_vm5, 0.0, %v1933_v53 }
 0x2f1   : > { %v1936_v60 = vsub.f32 %v1927_v5, %v1935_v29 }
 0x2f3   : > { %v1937_v18 = vmul.f32 1.442695, %v1936_v60 }
 0x2f5   : > { %5242 = vpow2.f32 %v1937_v18 }
 0x302   : > { %v5243_v1 = vpop.eup %5242 }
 0x303   : > { %v1939_v41 = vsel %vm1930_vm4, %v5243_v1, 0.0 }
 0x304   : > { %1940 = vadd.xlane.f32.xlu1 %v1939_v41 }
 0x38d   : > { %v1941_v42 = vpop.xlane.xlu1 %1940 }
 0x38e   : > { %vm1942_vm6 = vcmp.eq.f32.partialorder %v1941_v42, 0.0 }
 0x38f   : > { %v1943_v45 = vsel %vm1942_vm6, 1.0, %v1941_v42 }
 0x390   : > { %5244 = vrcp.f32 %v1943_v45 }
 0x39d   : > { %v5245_v48 = vpop.eup %5244 }
 0x39e   : > { %v1945_v50 = vmul.f32 %v5245_v48, %v5243_v1 }
 0x3a0   : > { %v1947_v52 = vsel %vm1930_vm4, %v1945_v50, 0 }
 0x3a1   : > { %v2015_v55 = vand.u32 4294901760, %v1947_v52 }
 0x3a3   : > { %v2016_v56 = vsub.f32 %v1947_v52, %v2015_v55  ;;  %5061 = vmatmul.mubr.f32.vlgmr.msra.gmra.mxu1 %v2015_v55 }
 0x3a4   : > { %5069 = vmatpush3.msra.mxu1 %v5728_v57  ;;  %5070 = vmatprep.mubr.msk.f32.mxu1 %vm5272_vm1, %v6042_v9 }
 0x3a5   : > { %5078 = vmatprep.subr.mxu1 %v6042_v9  ;;  %v2017_v58 = vand.u32 4294901760, %v2016_v56 }
 0x3a7   : > { %5071 = vmatmul.mubr.f32.vlgmr.msra.gmra.mxu1 %v2017_v58  ;;  %v2018_v63 = vsub.f32 %v2016_v56, %v2017_v58 }
 0x3a8   : > { %5079 = vmatpush3.msra.mxu1 %v5728_v57  ;;  %5080 = vmatprep.mubr.msk.f32.mxu1 %vm5272_vm1, %v6042_v9  ;;  %v351_v57 = vld [vmem:[%s6039_s7 + $0x8] sm:$0xff] }
 0x3a9   : > { %v2019_v6 = vand.u32 4294901760, %v2018_v63  ;;  %5090 = vmatprep.subr.mxu1 %v6042_v9  ;;  %v5791_v7 = vand.u32 4294901760, %v351_v57 }
 0x3ab   : > { %5056 = vmatmul.mubr.f32.vlgmr.msra.gmra.mxu0 %v2019_v6  ;;  %5081 = vmatmul.mubr.f32.vlgmr.msra.gmra.mxu1 %v2015_v55 }
 0x3ac   : > { %5064 = vmatpush3.msra.mxu0 %v5731_v14  ;;  %5065 = vmatprep.mubr.msk.f32.mxu0 %vm5272_vm1, %v6042_v9  ;;  %v350_v14 = vld [vmem:[%s6039_s7] sm:$0xff] }
 0x3ad   : > { %5073 = vmatprep.subr.mxu0 %v6042_v9  ;;  %5094 = vmatprep.mubr.msk.f32.mxu1 %vm5272_vm1, %v6042_v9  ;;  %v5799_v24 = vand.u32 4294901760, %v350_v14 }
 0x3af   : > { %5066 = vmatmul.mubr.f32.vlgmr.msra.gmra.mxu0 %v2016_v56  ;;  %v5807_v51 = vsub.f32 %v350_v14, %v5799_v24 }
 0x3b0   : > { %5074 = vmatpush3.msra.mxu0 %v2058_v49  ;;  %5075 = vmatprep.mubr.msk.f32.mxu0 %vm5272_vm1, %v6042_v9  ;;  %v5797_v49 = vsub.f32 %v351_v57, %v5791_v7 }
 0x3b1   : > { %5083 = vmatprep.subr.mxu0 %v6042_v9  ;;  %v5814_v54 = vand.u32 4294901760, %v5807_v51 }
 0x3b2   : > { %v5804_v19 = vand.u32 4294901760, %v5797_v49 }
 0x3b3   : > { %5076 = vmatmul.mubr.f32.vlgmr.msra.gmra.mxu0 %v2015_v55  ;;  %v2514_v29 = vsub.f32 %v5807_v51, %v5814_v54 }
 0x3b4   : > { %5087 = vmatprep.mubr.msk.f32.mxu0 %vm5272_vm1, %v6042_v9  ;;  %5084 = vmatpush3.msra.mxu0 %v5791_v7  ;;  %v2507_v5 = vsub.f32 %v5797_v49, %v5804_v19 }
 0x3b5   : > { %5085 = vmatprep.subr.mxu0 %v6042_v9  ;;  %v5821_v60 = vand.u32 4294901760, %v2514_v29 }
 0x3b6   : > { %5086 = vmatpush3.msra.mxu0 %v5799_v24  ;;  %v5816_v53 = vand.u32 4294901760, %v2507_v5 }
 0x3b7   : > { %5097 = vmatprep.subr.mxu0 %v6042_v9  ;;  %6047 = vst [vmem:[#allocation3_spill] sm:$0xff] %v5821_v60 }
 0x3b8   : > { %6046 = vst [vmem:[#allocation2_spill] sm:$0xff] %v5816_v53  ;;  %5091 = vmatpush3.msra.mxu1 %v5816_v53 }
 0x3b9   : > { %5092 = vmatprep.subr.mxu1 %v6042_v9 }
 0x3ba   : > { %5093 = vmatpush3.msra.mxu1 %v5821_v60 }
 0x3bb   : > { %5104 = vmatprep.subr.mxu1 %v6042_v9 }
 0x463   : > { %v2097_v18 = vpop.f32.mrf.mxu1 }
 0x465   : > { %v5062_v1 = vpop.f32.mrf.mxu1 }
 0x466   : > { %v6048_v1 = vmov 0.0  }
 0x467   : > { %v2245_v41 = vpop.f32.mrf.mxu1 }
 0x469   : > { %v5072_v42 = vpop.f32.mrf.mxu1 }
 0x46b   : > { %v2021_v45 = vpop.f32.mrf.mxu0  ;;  %v2391_v48 = vpop.f32.mrf.mxu1 }
 0x46c   : > { %v2098_v55 = vadd.f32 %v2097_v18, %v2021_v45 }
 0x46d   : > { %v5057_v50 = vpop.f32.mrf.mxu0  ;;  %v5082_v52 = vpop.f32.mrf.mxu1 }
 0x46f   : > { %v2171_v56 = vpop.f32.mrf.mxu0 }
 0x470   : > { %v2172_v58 = vadd.f32 %v2171_v56, %v2098_v55 }
 0x471   : > { %v5067_v63 = vpop.f32.mrf.mxu0 }
 0x472   : > { %v2246_v6 = vadd.f32 %v2245_v41, %v2172_v58 }
 0x473   : > { %v2319_v57 = vpop.f32.mrf.mxu0 }
 0x474   : > { %v2320_v14 = vadd.f32 %v2319_v57, %v2246_v6 }
 0x475   : > { %v5077_v5 = vpop.f32.mrf.mxu0 }
 0x476   : > { %v2392_v29 = vadd.f32 %v2391_v48, %v2320_v14 }
 0x478   : > { %v2396_v60 = vsel %vm1479_vm2, %v2392_v29, 0  ;;  %v2867_v29 = vpop.permute.xlu0 %2866 }
 0x479   : > { %v2465_v9 = vand.u32 4294901760, %v2396_v60 }
 0x47b   : > { %v2466_v53 = vsub.f32 %v2396_v60, %v2465_v9  ;;  %5095 = vmatmul.mubr.f32.vlgmr.msra.gmra.mxu1 %v2465_v9 }
 0x47c   : > { %5105 = vmatpush3.msra.mxu1 %v5791_v7  ;;  %5108 = vmatprep.mubr.msk.f32.mxu1 %vm5272_vm1, %v6048_v1 }
 0x47d   : > { %5106 = vmatprep.subr.mxu1 %v6048_v1  ;;  %v2467_v18 = vand.u32 4294901760, %v2466_v53 }
 0x47e   : > { %5107 = vmatpush3.msra.mxu1 %v5799_v24 }
 0x47f   : > { %5109 = vmatmul.mubr.f32.vlgmr.msra.gmra.mxu1 %v2467_v18  ;;  %5118 = vmatprep.subr.mxu1 %v6048_v1  ;;  %v2468_v41 = vsub.f32 %v2466_v53, %v2467_v18 }
 0x480   : > { %5119 = vmatpush3.msra.mxu1 %v5791_v7  ;;  %5122 = vmatprep.mubr.msk.f32.mxu1 %vm5272_vm1, %v6048_v1 }
 0x481   : > { %5120 = vmatprep.subr.mxu1 %v6048_v1  ;;  %v2469_v60 = vand.u32 4294901760, %v2468_v41 }
 0x482   : > { %5121 = vmatpush3.msra.mxu1 %v5799_v24 }
 0x483   : > { %5088 = vmatmul.mubr.f32.vlgmr.msra.gmra.mxu0 %v2469_v60  ;;  %5123 = vmatmul.mubr.f32.vlgmr.msra.gmra.mxu1 %v2465_v9 }
 0x484   : > { %5098 = vmatpush3.msra.mxu0 %v5797_v49  ;;  %5101 = vmatprep.mubr.msk.f32.mxu0 %vm5272_vm1, %v6048_v1 }
 0x485   : > { %5099 = vmatprep.subr.mxu0 %v6048_v1  ;;  %3005 = vmatprep.subr.mxu1 %v5609_v28 }
 0x486   : > { %5100 = vmatpush3.msra.mxu0 %v5807_v51  ;;  %3011 = vmatpush1.msra.mxu1 %v5615_v12 }
 0x487   : > { %5102 = vmatmul.mubr.f32.vlgmr.msra.gmra.mxu0 %v2466_v53  ;;  %5111 = vmatprep.subr.mxu0 %v6048_v1 }
 0x488   : > { %5112 = vmatpush3.msra.mxu0 %v5804_v19  ;;  %5115 = vmatprep.mubr.msk.f32.mxu0 %vm5272_vm1, %v6048_v1 }
 0x489   : > { %5113 = vmatprep.subr.mxu0 %v6048_v1  ;;  %3017 = vmatprep.subr.mxu1 %v5621_v35 }
 0x48a   : > { %5114 = vmatpush3.msra.mxu0 %v5814_v54  ;;  %3023 = vmatpush1.msra.mxu1 %v5630_v21 }
 0x48b   : > { %5116 = vmatmul.mubr.f32.vlgmr.msra.gmra.mxu0 %v2465_v9  ;;  %3029 = vmatprep.subr.mxu1 %v5636_v43 }
 0x48c   : > { %3035 = vmatpush1.msra.mxu1 %v5640_v44  ;;  %2917 = vmatprep.subr.mxu0 %v5474_v59 }
 0x48d   : > { %3041 = vmatprep.subr.mxu1 %v5644_v46  ;;  %3080 = vmatprep.mubr.f32.mxu1 %v6048_v1 }
 0x48e   : > { %3047 = vmatpush1.msra.mxu1 %v5648_v47  ;;  %2919 = vmatpush1.msra.mxu0 %v5483_v62 }
 0x48f   : > { %3202 = vmatprep.subr.mxu1 %v5474_v59  ;;  %2921 = vmatprep.subr.mxu0 %v5490_v0 }
 0x490   : > { %2923 = vmatpush1.msra.mxu0 %v5497_v2  ;;  %2964 = vmatprep.mubr.f32.mxu0 %v6048_v1 }
 0x491   : > { %2925 = vmatprep.subr.mxu0 %v5509_v13 }
 0x492   : > { %2927 = vmatpush1.msra.mxu0 %v5519_v32 }
 0x493   : > { %2929 = vmatprep.subr.mxu0 %v5526_v34 }
 0x494   : > { %2931 = vmatpush1.msra.mxu0 %v5535_v38 }
 0x495   : > { %3114 = vmatprep.subr.mxu0 %v5507_v8 }
 0x53b   : > { %v2552_v9 = vpop.f32.mrf.mxu1 }
 0x53d   : > { %v5096_v28 = vpop.f32.mrf.mxu1 }
 0x53f   : > { %v2703_v12 = vpop.f32.mrf.mxu1 }
 0x541   : > { %v5110_v35 = vpop.f32.mrf.mxu1 }
 0x543   : > { %v2471_v21 = vpop.f32.mrf.mxu0  ;;  %v2853_v43 = vpop.f32.mrf.mxu1 }
 0x544   : > { %v2553_v47 = vadd.f32 %v2552_v9, %v2471_v21 }
 0x545   : > { %v5089_v44 = vpop.f32.mrf.mxu0  ;;  %v5124_v46 = vpop.f32.mrf.mxu1 }
 0x547   : > { %v2628_v53 = vpop.f32.mrf.mxu0 }
 0x548   : > { %v2629_v42 = vadd.f32 %v2628_v53, %v2553_v47 }
 0x549   : > { %v5103_v45 = vpop.f32.mrf.mxu0 }
 0x54a   : > { %v2704_v48 = vadd.f32 %v2703_v12, %v2629_v42 }
 0x54b   : > { %v2780_v50 = vpop.f32.mrf.mxu0 }
 0x54c   : > { %v2781_v52 = vadd.f32 %v2780_v50, %v2704_v48 }
 0x54d   : > { %v5117_v55 = vpop.f32.mrf.mxu0 }
 0x54e   : > { %v2854_v56 = vadd.f32 %v2853_v43, %v2781_v52 }
 0x550   : > { %v2857_v58 = vadd.f32 %v2854_v56, %v5704_v22 }
 0x552   : > { %v2858_v8 = vadd.f32 %v2857_v58, %v5721_v4 }
 0x554   : > { %v2859_v63 = vsub.f32 0.0, %v2858_v8 }
 0x556   : > { %v2860_v6 = vmul.f32 1.442695, %v2859_v63 }
 0x558   : > { %5246 = vpow2.f32 %v2860_v6 }
 0x565   : > { %v5247_v57 = vpop.eup %5246 }
 0x566   : > { %v2862_v14 = vadd.f32 1.0, %v5247_v57 }
 0x568   : > { %5248 = vrcp.f32 %v2862_v14 }
 0x575   : > { %v5249_v5 = vpop.eup %5248 }
 0x576   : > { %v2869_v18 = vmul.f32 %v5249_v5, %v2867_v29  ;;  %v2876_v28 = vsub.f32 1.0, %v5249_v5 }
 0x578   : > { %2871 = vrot.lane.b32.xlu1 %v2869_v18, %s5274_s14 }
 0x5ea   : > { %v2872_v41 = vpop.permute.xlu1 %2871 }
 0x5eb   : > { %v2874_v60 = vadd.f32 %v2872_v41, %v2857_v58 }
 0x5ed   : > { %5250 = vtanh.f32 %v2874_v60 }
 0x5fa   : > { %v5251_v9 = vpop.eup %5250 }
 0x5fb   : > { %2878 = vrot.lane.b32.xlu0 %v5251_v9, %s5273_s13 }
 0x5ff   : > { %2882 = vrot.lane.b32.xlu0 %v5479_v61, %s5276_s22 }
 0x66d   : > { %v2879_v4 = vpop.permute.xlu0 %2878 }
 0x66e   : > { %v2881_v35 = vmul.f32 %v2879_v4, %v2876_v28 }
 0x671   : > { %v2883_v12 = vpop.permute.xlu0 %2882 }
 0x672   : > { %v2885_v21 = vmul.f32 %v5249_v5, %v2883_v12 }
 0x674   : > { %v5874_v43 = vadd.f32 %v2885_v21, %v2881_v35 }
 0x676   : > { %2888 = vrot.lane.b32.xlu0 %v5874_v43, %s5273_s13 }
 0x6e8   : > { %v2889_v44 = vpop.permute.xlu0 %2888 }
 0x6e9   : > { %v2890_v46 = vsel %vm373_vm0, %v2889_v44, 0 }
 0x6ea   : > { %v2965_v47 = vand.u32 4294901760, %v2890_v46 }
 0x6ec   : > { %v2966_v53 = vsub.f32 %v2890_v46, %v2965_v47  ;;  %3082 = vmatmul.mubr.f32.vlgmr.msra.gmra.mxu1 %v2965_v47 }
 0x6ed   : > { %3204 = vmatpush1.msra.mxu1 %v5483_v62  ;;  %3249 = vmatprep.mubr.f32.mxu1 %v6048_v1 }
 0x6ee   : > { %v2967_v61 = vand.u32 4294901760, %v2966_v53  ;;  %3206 = vmatprep.subr.mxu1 %v5490_v0 }
 0x6ef   : > { %3208 = vmatpush1.msra.mxu1 %v5497_v2 }
 0x6f0   : > { %v2968_v42 = vsub.f32 %v2966_v53, %v2967_v61  ;;  %3210 = vmatprep.subr.mxu1 %v5509_v13 }
 0x6f1   : > { %3212 = vmatpush1.msra.mxu1 %v5519_v32 }
 0x6f2   : > { %v2969_v45 = vand.u32 4294901760, %v2968_v42  ;;  %3214 = vmatprep.subr.mxu1 %v5526_v34 }
 0x6f3   : > { %3216 = vmatpush1.msra.mxu1 %v5535_v38 }
 0x6f4   : > { %3253 = vmatmul.mubr.f32.vlgmr.msra.gmra.mxu1 %v2967_v61  ;;  %3380 = vmatprep.subr.mxu1 %v5474_v59 }
 0x6f5   : > { %2970 = vmatmul.mubr.f32.vlgmr.msra.gmra.mxu0 %v2969_v45  ;;  %3382 = vmatpush1.msra.mxu1 %v5483_v62 }
 0x6f6   : > { %3117 = vmatpush1.msra.mxu0 %v5517_v30  ;;  %3384 = vmatprep.subr.mxu1 %v5490_v0 }
 0x6f7   : > { %3120 = vmatprep.subr.mxu0 %v5524_v33  ;;  %3386 = vmatpush1.msra.mxu1 %v5497_v2 }
 0x6f8   : > { %3123 = vmatpush1.msra.mxu0 %v5533_v37  ;;  %3388 = vmatprep.subr.mxu1 %v5509_v13 }
 0x6f9   : > { %3126 = vmatprep.subr.mxu0 %v5544_v40  ;;  %3390 = vmatpush1.msra.mxu1 %v5519_v32 }
 0x6fa   : > { %3129 = vmatpush1.msra.mxu0 %v5552_v23  ;;  %3392 = vmatprep.subr.mxu1 %v5526_v34 }
 0x6fb   : > { %3132 = vmatprep.subr.mxu0 %v5564_v17  ;;  %3168 = vmatprep.mubr.f32.mxu0 %v6048_v1 }
 0x6fc   : > { %3135 = vmatpush1.msra.mxu0 %v5573_v3  ;;  %3394 = vmatpush1.msra.mxu1 %v5535_v38 }
 0x6fd   : > { %3427 = vmatprep.mubr.f32.mxu1 %v6048_v1  ;;  %3171 = vmatmul.mubr.f32.vlgmr.msra.gmra.mxu0 %v2966_v53 }
 0x6fe   : > { %3286 = vmatprep.subr.mxu0 %v5541_v39  ;;  %3429 = vmatmul.mubr.f32.vlgmr.msra.gmra.mxu1 %v2965_v47 }
 0x6ff   : > { %3290 = vmatpush1.msra.mxu0 %v5549_v15  ;;  %3347 = vmatprep.mubr.f32.mxu0 %v6048_v1 }
 0x700   : > { %3294 = vmatprep.subr.mxu0 %v5558_v16  ;;  %5130 = vmatprep.subr.mxu1 %v6048_v1 }
 0x701   : > { %3298 = vmatpush1.msra.mxu0 %v5570_v25  ;;  %5132 = vmatprep.mubr.msk.f32.mxu1 %vm5272_vm1, %v6048_v1 }
 0x702   : > { %3302 = vmatprep.subr.mxu0 %v5581_v27 }
 0x703   : > { %3306 = vmatpush1.msra.mxu0 %v5589_v20 }
 0x704   : > { %3310 = vmatprep.subr.mxu0 %v5598_v10 }
 0x705   : > { %3314 = vmatpush1.msra.mxu0 %v5605_v11 }
 0x706   : > { %3349 = vmatmul.mubr.f32.vlgmr.msra.gmra.mxu0 %v2965_v47  ;;  %5125 = vmatprep.subr.mxu0 %v6048_v1 }
 0x707   : > { %5127 = vmatprep.mubr.msk.f32.mxu0 %vm5272_vm1, %v6048_v1 }
 0x7ac   : > { %v3083_v59 = vpop.f32.mrf.mxu1 }
 0x7ae   : > { %v3085_v0 = vpop.f32.mrf.mxu1 }
 0x7b4   : > { %v3254_v30 = vpop.f32.mrf.mxu1 }
 0x7b5   : > { %v2971_v62 = vpop.f32.mrf.mxu0 }
 0x7b6   : > { %v3084_v33 = vadd.f32 %v3083_v59, %v2971_v62  ;;  %v3256_v38 = vpop.f32.mrf.mxu1 }
 0x7b7   : > { %v2973_v2 = vpop.f32.mrf.mxu0 }
 0x7b8   : > { %v3086_v13 = vadd.f32 %v3085_v0, %v2973_v2 }
 0x7bd   : > { %v3172_v32 = vpop.f32.mrf.mxu0 }
 0x7be   : > { %v3173_v39 = vadd.f32 %v3172_v32, %v3084_v33  ;;  %v3430_v17 = vpop.f32.mrf.mxu1 }
 0x7bf   : > { %v3174_v34 = vpop.f32.mrf.mxu0 }
 0x7c0   : > { %v3175_v37 = vadd.f32 %v3174_v34, %v3086_v13  ;;  %v3255_v15 = vadd.f32 %v3254_v30, %v3173_v39  ;;  %v3432_v9 = vpop.f32.mrf.mxu1 }
 0x7c2   : > { %v5919_v40 = vadd.f32 %v3256_v38, %v3175_v37 }
 0x7c6   : > { %v3350_v23 = vpop.f32.mrf.mxu0 }
 0x7c7   : > { %v3351_v16 = vadd.f32 %v3350_v23, %v3255_v15 }
 0x7c8   : > { %v3352_v41 = vpop.f32.mrf.mxu0 }
 0x7c9   : > { %v3431_v25 = vadd.f32 %v3430_v17, %v3351_v16 }
 0x7cb   : > { %v3435_v3 = vadd.f32 %v3431_v25, %v5706_v26 }
 0x7cd   : > { %3438 = vrot.lane.b32.xlu1 %v3435_v3, %s5273_s13  ;;  %3440 = vrot.lane.b32.xlu0 %v3435_v3, %s5271_s10  ;;  %v5927_v26 = vand.u32 4294901760, %v3435_v3 }
 0x7cf   : > { %v5930_v14 = vsub.f32 %v3435_v3, %v5927_v26 }
 0x7d1   : > { %v4019_v5 = vand.u32 4294901760, %v5930_v14 }
 0x7d3   : > { %v4020_v29 = vsub.f32 %v5930_v14, %v4019_v5 }
 0x7d5   : > { %v4021_v18 = vand.u32 4294901760, %v4020_v29 }
 0x83f   : > { %v3439_v27 = vpop.permute.xlu1 %3438  ;;  %v3441_v20 = vpop.permute.xlu0 %3440 }
 0x840   : > { %v3442_v10 = vsel %vm1479_vm2, %v3439_v27, 0  ;;  %v3444_v11 = vsel %vm1479_vm2, %v3441_v20, 0 }
 0x841   : > { %v3512_v48 = vand.u32 4294901760, %v3442_v10  ;;  %v3477_v50 = vand.u32 4294901760, %v3444_v11 }
 0x843   : > { %v3513_v52 = vsub.f32 %v3442_v10, %v3512_v48  ;;  %v3554_v55 = vsub.f32 %v3444_v11, %v3477_v50  ;;  %5126 = vmatpush3.xpose.msra.mxu0 %v3477_v50 }
 0x844   : > { %5135 = vmatprep.subr.mxu0 %v6048_v1 }
 0x845   : > { %v3514_v56 = vand.u32 4294901760, %v3513_v52  ;;  %v3555_v58 = vand.u32 4294901760, %v3554_v55 }
 0x847   : > { %v3515_v8 = vsub.f32 %v3513_v52, %v3514_v56  ;;  %v3556_v63 = vsub.f32 %v3554_v55, %v3555_v58 }
 0x849   : > { %v3516_v6 = vand.u32 4294901760, %v3515_v8  ;;  %v3557_v57 = vand.u32 4294901760, %v3556_v63 }
 0x84b   : > { %5128 = vmatmul.mubr.f32.vlgmr.msra.gmra.mxu0 %v3516_v6  ;;  %5131 = vmatpush3.xpose.msra.mxu1 %v3557_v57 }
 0x84c   : > { %5136 = vmatpush3.xpose.msra.mxu0 %v3554_v55  ;;  %5137 = vmatprep.mubr.msk.f32.mxu0 %vm5272_vm1, %v6048_v1 }
 0x84d   : > { %5140 = vmatprep.subr.mxu1 %v6048_v1  ;;  %5145 = vmatprep.subr.mxu0 %v6048_v1 }
 0x84e   : > { %5133 = vmatmul.mubr.f32.vlgmr.msra.gmra.mxu1 %v3512_v48 }
 0x84f   : > { %5138 = vmatmul.mubr.f32.vlgmr.msra.gmra.mxu0 %v3513_v52  ;;  %5141 = vmatpush3.xpose.msra.mxu1 %v3477_v50 }
 0x850   : > { %5146 = vmatpush3.xpose.msra.mxu0 %v3555_v58  ;;  %5142 = vmatprep.mubr.msk.f32.mxu1 %vm5272_vm1, %v6048_v1 }
 0x851   : > { %5147 = vmatprep.mubr.msk.f32.mxu0 %vm5272_vm1, %v6048_v1  ;;  %5150 = vmatprep.subr.mxu1 %v6048_v1 }
 0x852   : > { %5143 = vmatmul.mubr.f32.vlgmr.msra.gmra.mxu1 %v3514_v56  ;;  %5155 = vmatprep.subr.mxu0 %v6048_v1 }
 0x853   : > { %5148 = vmatmul.mubr.f32.vlgmr.msra.gmra.mxu0 %v3512_v48  ;;  %5151 = vmatpush3.xpose.msra.mxu1 %v3477_v50  ;;  %v6050_v50 = vld [vmem:[#allocation3_spill] sm:$0xff] }
 0x854   : > { %5156 = vmatpush3.msra.mxu0 %v5927_v26  ;;  %5152 = vmatprep.mubr.msk.f32.mxu1 %vm5272_vm1, %v6048_v1 }
 0x855   : > { %5160 = vmatprep.subr.mxu1 %v6048_v1  ;;  %5157 = vmatprep.mubr.msk.f32.mxu0 %vm5272_vm1, %v6048_v1 }
 0x856   : > { %5153 = vmatmul.mubr.f32.vlgmr.msra.gmra.mxu1 %v3512_v48  ;;  %5165 = vmatprep.subr.mxu0 %v6048_v1  ;;  %v6049_v48 = vld [vmem:[#allocation2_spill] sm:$0xff] }
 0x857   : > { %5161 = vmatpush3.msra.mxu1 %v4021_v18  ;;  %5162 = vmatprep.mubr.msk.f32.mxu1 %vm5272_vm1, %v6048_v1 }
 0x858   : > { %5170 = vmatprep.subr.mxu1 %v6048_v1 }
 0x90b   : > { %v3518_v60 = vpop.f32.mrf.mxu0 }
 0x90c   : > { %v3519_v4 = vadd.f32 %v3518_v60, %v5761_v31  ;;  %v3353_v31 = vadd.f32 %v3352_v41, %v5919_v40 }
 0x90d   : > { %v5129_v28 = vpop.f32.mrf.mxu0 }
 0x90e   : > { %v3594_v12 = vpop.f32.mrf.mxu1  ;;  %v3433_v32 = vadd.f32 %v3432_v9, %v3353_v31 }
 0x90f   : > { %v3595_v35 = vadd.f32 %v3594_v12, %v3519_v4  ;;  %v3668_v21 = vpop.f32.mrf.mxu0 }
 0x910   : > { %v5134_v44 = vpop.f32.mrf.mxu1  ;;  %v5960_v33 = vadd.f32 %v5717_v36, %v3433_v32 }
 0x911   : > { %v3669_v46 = vadd.f32 %v3668_v21, %v3595_v35  ;;  %v5139_v47 = vpop.f32.mrf.mxu0 }
 0x912   : > { %v3742_v53 = vpop.f32.mrf.mxu1 }
 0x913   : > { %v3743_v61 = vadd.f32 %v3742_v53, %v3669_v46  ;;  %v3816_v42 = vpop.f32.mrf.mxu0 }
 0x914   : > { %v5144_v45 = vpop.f32.mrf.mxu1 }
 0x915   : > { %v3817_v59 = vadd.f32 %v3816_v42, %v3743_v61  ;;  %v5149_v62 = vpop.f32.mrf.mxu0 }
 0x916   : > { %v3888_v0 = vpop.f32.mrf.mxu1 }
 0x917   : > { %v3889_v2 = vadd.f32 %v3888_v0, %v3817_v59 }
 0x918   : > { %v5154_v13 = vpop.f32.mrf.mxu1 }
 0x919   : > { %v3892_v30 = vsel %vm1930_vm4, %v3889_v2, -inf }
 0x91a   : > { %3893 = vmax.xlane.f32.xlu0 %v3892_v30 }
 0x930   : > { %4827 = vrot.lane.b32.xlu0 %v5960_v33, %s5274_s14 }
 0x9a3   : > { %v3894_v34 = vpop.xlane.xlu0 %3893 }
 0x9a4   : > { %vm3895_vm7 = vcmp.lt.f32.partialorder %v3894_v34, -1e+29 }
 0x9a5   : > { %v3896_v37 = vsel %vm3895_vm7, 0.0, %v3894_v34 }
 0x9a6   : > { %v3897_v38 = vsub.f32 %v3889_v2, %v3896_v37 }
 0x9a8   : > { %v3898_v39 = vmul.f32 1.442695, %v3897_v38 }
 0x9aa   : > { %5252 = vpow2.f32 %v3898_v39 }
 0x9b7   : > { %v5253_v15 = vpop.eup %5252 }
 0x9b8   : > { %v3900_v23 = vsel %vm1930_vm4, %v5253_v15, 0.0 }
 0x9b9   : > { %3901 = vadd.xlane.f32.xlu1 %v3900_v23 }
 0xa42   : > { %v3902_v16 = vpop.xlane.xlu1 %3901 }
 0xa43   : > { %vm3903_vm8 = vcmp.eq.f32.partialorder %v3902_v16, 0.0 }
 0xa44   : > { %v3904_v40 = vsel %vm3903_vm8, 1.0, %v3902_v16 }
 0xa45   : > { %5254 = vrcp.f32 %v3904_v40 }
 0xa52   : > { %v5255_v17 = vpop.eup %5254 }
 0xa53   : > { %v3906_v36 = vmul.f32 %v5255_v17, %v5253_v15  ;;  %v4828_v15 = vpop.permute.xlu0 %4827 }
 0xa55   : > { %v3908_v25 = vsel %vm1930_vm4, %v3906_v36, 0 }
 0xa56   : > { %v3976_v3 = vand.u32 4294901760, %v3908_v25 }
 0xa58   : > { %v3977_v27 = vsub.f32 %v3908_v25, %v3976_v3  ;;  %5163 = vmatmul.mubr.f32.vlgmr.msra.gmra.mxu1 %v3976_v3 }
 0xa59   : > { %5171 = vmatpush3.msra.mxu1 %v5927_v26  ;;  %5172 = vmatprep.mubr.msk.f32.mxu1 %vm5272_vm1, %v6048_v1 }
 0xa5a   : > { %5180 = vmatprep.subr.mxu1 %v6048_v1  ;;  %v3978_v20 = vand.u32 4294901760, %v3977_v27 }
 0xa5c   : > { %5173 = vmatmul.mubr.f32.vlgmr.msra.gmra.mxu1 %v3978_v20  ;;  %v3979_v10 = vsub.f32 %v3977_v27, %v3978_v20 }
 0xa5d   : > { %5181 = vmatpush3.msra.mxu1 %v5927_v26  ;;  %5182 = vmatprep.mubr.msk.f32.mxu1 %vm5272_vm1, %v6048_v1 }
 0xa5e   : > { %v3980_v11 = vand.u32 4294901760, %v3979_v10  ;;  %5192 = vmatprep.subr.mxu1 %v6048_v1 }
 0xa60   : > { %5158 = vmatmul.mubr.f32.vlgmr.msra.gmra.mxu0 %v3980_v11  ;;  %5183 = vmatmul.mubr.f32.vlgmr.msra.gmra.mxu1 %v3976_v3 }
 0xa61   : > { %5166 = vmatpush3.msra.mxu0 %v5930_v14  ;;  %5167 = vmatprep.mubr.msk.f32.mxu0 %vm5272_vm1, %v6048_v1 }
 0xa62   : > { %5175 = vmatprep.subr.mxu0 %v6048_v1  ;;  %5193 = vmatpush3.msra.mxu1 %v6049_v48 }
 0xa63   : > { %5194 = vmatprep.subr.mxu1 %v6048_v1  ;;  %5196 = vmatprep.mubr.msk.f32.mxu1 %vm5272_vm1, %v6048_v1 }
 0xa64   : > { %5168 = vmatmul.mubr.f32.vlgmr.msra.gmra.mxu0 %v3977_v27  ;;  %5195 = vmatpush3.msra.mxu1 %v6050_v50 }
 0xa65   : > { %5176 = vmatpush3.msra.mxu0 %v4019_v5  ;;  %5177 = vmatprep.mubr.msk.f32.mxu0 %vm5272_vm1, %v6048_v1 }
 0xa66   : > { %5206 = vmatprep.subr.mxu1 %v6048_v1  ;;  %5185 = vmatprep.subr.mxu0 %v6048_v1 }
 0xa68   : > { %5178 = vmatmul.mubr.f32.vlgmr.msra.gmra.mxu0 %v3976_v3 }
 0xa69   : > { %5186 = vmatpush3.msra.mxu0 %v5791_v7  ;;  %5189 = vmatprep.mubr.msk.f32.mxu0 %vm5272_vm1, %v6048_v1 }
 0xa6a   : > { %5187 = vmatprep.subr.mxu0 %v6048_v1 }
 0xa6b   : > { %5188 = vmatpush3.msra.mxu0 %v5799_v24 }
 0xa6c   : > { %5199 = vmatprep.subr.mxu0 %v6048_v1 }
 0xb18   : > { %v4058_v52 = vpop.f32.mrf.mxu1 }
 0xb1a   : > { %v5164_v55 = vpop.f32.mrf.mxu1 }
 0xb1c   : > { %v4206_v56 = vpop.f32.mrf.mxu1 }
 0xb1e   : > { %v5174_v58 = vpop.f32.mrf.mxu1 }
 0xb20   : > { %v3982_v26 = vpop.f32.mrf.mxu0  ;;  %v4352_v8 = vpop.f32.mrf.mxu1 }
 0xb21   : > { %v4059_v57 = vadd.f32 %v4058_v52, %v3982_v26 }
 0xb22   : > { %v5159_v63 = vpop.f32.mrf.mxu0  ;;  %v5184_v6 = vpop.f32.mrf.mxu1 }
 0xb24   : > { %v4132_v14 = vpop.f32.mrf.mxu0 }
 0xb25   : > { %v4133_v5 = vadd.f32 %v4132_v14, %v4059_v57 }
 0xb26   : > { %v5169_v29 = vpop.f32.mrf.mxu0 }
 0xb27   : > { %v4207_v18 = vadd.f32 %v4206_v56, %v4133_v5 }
 0xb28   : > { %v4280_v41 = vpop.f32.mrf.mxu0 }
 0xb29   : > { %v4281_v60 = vadd.f32 %v4280_v41, %v4207_v18 }
 0xb2a   : > { %v5179_v9 = vpop.f32.mrf.mxu0 }
 0xb2b   : > { %v4353_v4 = vadd.f32 %v4352_v8, %v4281_v60 }
 0xb2d   : > { %v4357_v28 = vsel %vm1479_vm2, %v4353_v4, 0 }
 0xb2e   : > { %v4426_v12 = vand.u32 4294901760, %v4357_v28 }
 0xb30   : > { %v4427_v35 = vsub.f32 %v4357_v28, %v4426_v12  ;;  %5197 = vmatmul.mubr.f32.vlgmr.msra.gmra.mxu1 %v4426_v12 }
 0xb31   : > { %5207 = vmatpush3.msra.mxu1 %v5791_v7  ;;  %5210 = vmatprep.mubr.msk.f32.mxu1 %vm5272_vm1, %v6048_v1 }
 0xb32   : > { %5208 = vmatprep.subr.mxu1 %v6048_v1  ;;  %v4428_v21 = vand.u32 4294901760, %v4427_v35 }
 0xb33   : > { %5209 = vmatpush3.msra.mxu1 %v5799_v24 }
 0xb34   : > { %5211 = vmatmul.mubr.f32.vlgmr.msra.gmra.mxu1 %v4428_v21  ;;  %5220 = vmatprep.subr.mxu1 %v6048_v1  ;;  %v4429_v44 = vsub.f32 %v4427_v35, %v4428_v21 }
 0xb35   : > { %5221 = vmatpush3.msra.mxu1 %v5791_v7  ;;  %5224 = vmatprep.mubr.msk.f32.mxu1 %vm5272_vm1, %v6048_v1 }
 0xb36   : > { %5222 = vmatprep.subr.mxu1 %v6048_v1  ;;  %v4430_v46 = vand.u32 4294901760, %v4429_v44 }
 0xb37   : > { %5223 = vmatpush3.msra.mxu1 %v5799_v24 }
 0xb38   : > { %5190 = vmatmul.mubr.f32.vlgmr.msra.gmra.mxu0 %v4430_v46  ;;  %5225 = vmatmul.mubr.f32.vlgmr.msra.gmra.mxu1 %v4426_v12 }
 0xb39   : > { %5200 = vmatpush3.msra.mxu0 %v5797_v49  ;;  %5203 = vmatprep.mubr.msk.f32.mxu0 %vm5272_vm1, %v6048_v1 }
 0xb3a   : > { %5201 = vmatprep.subr.mxu0 %v6048_v1 }
 0xb3b   : > { %5202 = vmatpush3.msra.mxu0 %v5807_v51 }
 0xb3c   : > { %5204 = vmatmul.mubr.f32.vlgmr.msra.gmra.mxu0 %v4427_v35  ;;  %5213 = vmatprep.subr.mxu0 %v6048_v1 }
 0xb3d   : > { %5214 = vmatpush3.msra.mxu0 %v5804_v19  ;;  %5217 = vmatprep.mubr.msk.f32.mxu0 %vm5272_vm1, %v6048_v1 }
 0xb3e   : > { %5215 = vmatprep.subr.mxu0 %v6048_v1 }
 0xb3f   : > { %5216 = vmatpush3.msra.mxu0 %v5814_v54 }
 0xb40   : > { %5218 = vmatmul.mubr.f32.vlgmr.msra.gmra.mxu0 %v4426_v12 }
 0xbf0   : > { %v4513_v7 = vpop.f32.mrf.mxu1 }
 0xbf2   : > { %v5198_v49 = vpop.f32.mrf.mxu1 }
 0xbf4   : > { %v4664_v24 = vpop.f32.mrf.mxu1 }
 0xbf6   : > { %v5212_v47 = vpop.f32.mrf.mxu1 }
 0xbf8   : > { %v4432_v53 = vpop.f32.mrf.mxu0  ;;  %v4814_v61 = vpop.f32.mrf.mxu1 }
 0xbf9   : > { %v4514_v45 = vadd.f32 %v4513_v7, %v4432_v53 }
 0xbfa   : > { %v5191_v51 = vpop.f32.mrf.mxu0  ;;  %v5226_v42 = vpop.f32.mrf.mxu1 }
 0xbfc   : > { %v4589_v59 = vpop.f32.mrf.mxu0 }
 0xbfd   : > { %v4590_v62 = vadd.f32 %v4589_v59, %v4514_v45 }
 0xbfe   : > { %v5205_v19 = vpop.f32.mrf.mxu0 }
 0xbff   : > { %v4665_v0 = vadd.f32 %v4664_v24, %v4590_v62 }
 0xc00   : > { %v4741_v2 = vpop.f32.mrf.mxu0 }
 0xc01   : > { %v4742_v13 = vadd.f32 %v4741_v2, %v4665_v0 }
 0xc02   : > { %v5219_v30 = vpop.f32.mrf.mxu0 }
 0xc03   : > { %v4815_v1 = vadd.f32 %v4814_v61, %v4742_v13 }
 0xc05   : > { %v4818_v54 = vadd.f32 %v4815_v1, %v5704_v22 }
 0xc07   : > { %v4819_v31 = vadd.f32 %v4818_v54, %v5960_v33 }
 0xc09   : > { %v4820_v32 = vsub.f32 0.0, %v4819_v31 }
 0xc0b   : > { %v4821_v34 = vmul.f32 1.442695, %v4820_v32 }
 0xc0d   : > { %5256 = vpow2.f32 %v4821_v34 }
 0xc1a   : > { %v5257_v37 = vpop.eup %5256 }
 0xc1b   : > { %v4823_v38 = vadd.f32 1.0, %v5257_v37 }
 0xc1d   : > { %5258 = vrcp.f32 %v4823_v38 }
 0xc2a   : > { %v5259_v39 = vpop.eup %5258 }
 0xc2b   : > { %v4830_v23 = vmul.f32 %v5259_v39, %v4828_v15  ;;  %v4837_v22 = vsub.f32 1.0, %v5259_v39  ;;  %v4843_v36 = vmul.f32 %v5259_v39, %v5874_v43 }
 0xc2d   : > { %4832 = vrot.lane.b32.xlu1 %v4830_v23, %s5274_s14 }
 0xc9f   : > { %v4833_v16 = vpop.permute.xlu1 %4832 }
 0xca0   : > { %v4835_v40 = vadd.f32 %v4833_v16, %v4818_v54 }
 0xca2   : > { %5260 = vtanh.f32 %v4835_v40 }
 0xcaf   : > { %v5261_v17 = vpop.eup %5260 }
 0xcb0   : > { %4839 = vrot.lane.b32.xlu0 %v5261_v17, %s5273_s13 }
 0xd22   : > { %v4840_v33 = vpop.permute.xlu0 %4839 }
 0xd23   : > { %v4842_v25 = vmul.f32 %v4840_v33, %v4837_v22 }
 0xd25   : > { %v4844_v3 = vadd.f32 %v4843_v36, %v4842_v25 }
 0xd27   : > { %4846 = vrot.lane.b32.xlu1 %v4844_v3, %s5273_s13 }
 0xd99   : > { %v4847_v27 = vpop.permute.xlu1 %4846 }
 0xd9a   : > { %4849 = vst.msk [vmem:[%s334_s26] sm:$0xff] %vm373_vm0, %v4847_v27 }
 0xd9b PF: > { %s18_s27 = sadd.s32 1, %s5268_s27  }
 0xd9c   : > { %p15_p4 = scmp.ge.s32.totalorder %s18_s27, 4  }
 0xd9e   :  { %17 = sbr.rel (!%p15_p4) target bundleno = 1 (0x1), region = 88 }

</bundles_post_ra>
